<compile_context>
chip_gen: v7x
topology: tpu7x:2x2x1
jax: 0.10.0
libtpu: 0.0.40
codegen_flags: <defaults>
</compile_context>

<pallas_src>
import math

import jax
import jax.numpy as jnp
from jax.experimental import pallas as pl
from jax.experimental.pallas import tpu as pltpu

# ---------------- configuration (small synthetic shapes) ----------------
STRIPES = [2, 3]   # as in the PyTorch default
B = 16             # total batch (small demo)
BT = 4             # batch tile per grid step  (BT*HW = 768 = 3*256)
C_IN = 128         # stand-in for the trunk output channels (real: 1024)
H, W = 24, 8       # MGN hardcodes stride = 24 // stripe, so H must be 24
C_FEAT = 128       # stand-in for 2048 branch-backbone channels (per branch)
C_RED = 32         # stand-in for the 256-d reduction
NUM_CLASSES = 16   # stand-in for 1000 classes
BN_EPS = 1e-5

HW = H * W                                   # 192
NB = len(STRIPES)                            # 2 branches
C2 = NB * C_FEAT                             # 256 fused branch channels
P_TOTAL = sum(s + 1 for s in STRIPES)        # 7 parts (global + stripes, both branches)
PART_BRANCH = [bi for bi, s in enumerate(STRIPES) for _ in range(s + 1)]
TOTAL_TRI = P_TOTAL * C_RED                  # 224 (== eval output width)
TOTAL_LOGIT = P_TOTAL * NUM_CLASSES          # 112
OUT_PAD = ((TOTAL_TRI + TOTAL_LOGIT + 127) // 128) * 128   # 384, lane-dense slab


# ------------------------- the fused Pallas kernel -----------------------
def _mgn_fused_kernel(x_ref, wb_ref, wpool_ref, wred_ref, shift_ref,
                      wfc_ref, bfc_ref, out_ref):
    # One grid step == BT batch samples.  All intermediates stay in VMEM.
    # x_ref:     (BT, HW, C_IN)             bf16 trunk features for this tile
    # wb_ref:    (C_IN, C2)                 bf16 both branch 1x1-conv stand-ins
    # wpool_ref: (P_TOTAL*BT, BT*HW)        bf16 batch-block-diag pooling weights,
    #                                       rows ordered part-major (p*BT + b)
    # wred_ref:  (P_TOTAL, C_FEAT, C_RED)   bf16 per-part reduction, BN scale folded
    # shift_ref: (P_TOTAL, C_RED)           f32  BN shift (per-part bias)
    # wfc_ref:   (P_TOTAL, C_RED, NC)       bf16 per-part FC weights
    # bfc_ref:   (P_TOTAL, NC)              f32  per-part FC biases
    # out_ref:   (1, BT, OUT_PAD)           f32  [tri | logits | zero pad] slab
    x = x_ref[...].reshape(BT * HW, C_IN)                                 # bf16

    # Both branches' 1x1-conv + ReLU stand-in: one MXU matmul, M = BT*HW.
    net = jnp.dot(x, wb_ref[...], preferred_element_type=jnp.float32)     # (BT*HW, C2)
    net = jnp.maximum(net, 0.0).astype(jnp.bfloat16)

    # All global/stripe poolings of all BT samples: one MXU matmul, M = BT*P_TOTAL.
    pooled = jnp.dot(wpool_ref[...], net,
                     preferred_element_type=jnp.float32)                  # (P_TOTAL*BT, C2)
    pooled = pooled.astype(jnp.bfloat16)

    shift_all = shift_ref[...]                                            # (P_TOTAL, C_RED) f32
    bfc_all = bfc_ref[...]                                                # (P_TOTAL, NC)    f32

    feats, logits = [], []
    for p in range(P_TOTAL):                       # fully unrolled at trace time
        cs = PART_BRANCH[p] * C_FEAT
        blk = pooled[p * BT:(p + 1) * BT, cs:cs + C_FEAT]                 # (BT, C_FEAT) bf16
        # reduction (BN scale already folded into the weight) + BN shift
        feat = jnp.dot(blk, wred_ref[p],
                       preferred_element_type=jnp.float32)                # (BT, C_RED) f32
        feat = feat + shift_all[p:p + 1, :]
        feats.append(feat)
        # FC classifier (training-path logits).  TODO(synk): nn.Dropout before
        # the FC is treated as identity (no torch RNG; eval-exact anyway).
        lg = jnp.dot(feat.astype(jnp.bfloat16), wfc_ref[p],
                     preferred_element_type=jnp.float32) + bfc_all[p:p + 1, :]
        logits.append(lg)

    pieces = feats + logits
    pad = OUT_PAD - TOTAL_TRI - TOTAL_LOGIT
    if pad > 0:
        pieces.append(jnp.zeros((BT, pad), jnp.float32))
    out_ref[0] = jnp.concatenate(pieces, axis=1).astype(out_ref.dtype)    # lane-dense (BT, 384)


def mgn_fused_call(x, f):
    b = x.shape[0]
    assert b % BT == 0, (b, BT)
    # TODO(synk): at real MGN scale (C_IN=1024, C_FEAT=2048, NC~1000) tile the
    # conv over spatial rows, single-buffer the invariant weights and resize
    # vmem_limit_bytes; the whole-array weight blocks here are tiny (<1 MiB).
    out = pl.pallas_call(
        _mgn_fused_kernel,
        out_shape=jax.ShapeDtypeStruct((b // BT, BT, OUT_PAD), jnp.float32),
        grid=(b // BT,),
        in_specs=[
            pl.BlockSpec((BT, HW, C_IN), lambda i: (i, 0, 0)),
            pl.BlockSpec((C_IN, C2), lambda i: (0, 0)),
            pl.BlockSpec((P_TOTAL * BT, BT * HW), lambda i: (0, 0)),
            pl.BlockSpec((P_TOTAL, C_FEAT, C_RED), lambda i: (0, 0, 0)),
            pl.BlockSpec((P_TOTAL, C_RED), lambda i: (0, 0)),
            pl.BlockSpec((P_TOTAL, C_RED, NUM_CLASSES), lambda i: (0, 0, 0)),
            pl.BlockSpec((P_TOTAL, NUM_CLASSES), lambda i: (0, 0)),
        ],
        out_specs=pl.BlockSpec((1, BT, OUT_PAD), lambda i: (i, 0, 0)),
        compiler_params=pltpu.CompilerParams(
            dimension_semantics=("parallel",),     # batch tiles: 2 TCs on v7x
            vmem_limit_bytes=32 * 1024 * 1024),
    )(x, f["wbcat"], f["wpool_bt"], f["wred"], f["shift"], f["wfc"], f["bfc"])
    return out.reshape(b, OUT_PAD)


# ------------------------- parameter setup (glue) ------------------------
def build_pool_weights(stripe):
    """Spatial averaging weights: row 0 = GAP, rows 1..stripe = H-stripe pools."""
    rows = [jnp.full((H,), 1.0 / (H * W), jnp.float32)]
    stride = 24 // stripe                       # exactly as in the PyTorch code
    for i in range(stripe):
        r = jnp.zeros((H,), jnp.float32)
        r = r.at[i * stride:(i + 1) * stride].set(1.0 / (stride * W))
        rows.append(r)
    w_h = jnp.stack(rows)                       # (P, H)
    return jnp.repeat(w_h, W, axis=1)           # (P, H*W); flat index = h*W + w


def init_params(key):
    k_red, k_fc, k_br = jax.random.split(key, 3)
    # reduction = Conv2d(2048,256,1,bias=False) init N(0, sqrt(2/256)^2),
    # BatchNorm2d weight=1, bias=0; eval running stats mean=0, var=1.
    wred_base = jax.random.normal(k_red, (C_FEAT, C_RED), jnp.float32) * math.sqrt(2.0 / 256)
    bn_scale = jnp.full((C_RED,), 1.0 / math.sqrt(1.0 + BN_EPS), jnp.float32)
    bn_shift = jnp.zeros((C_RED,), jnp.float32)
    # fc = Linear(256, num_classes) init N(0, 0.001^2), bias=0.
    wfc_base = jax.random.normal(k_fc, (C_RED, NUM_CLASSES), jnp.float32) * 0.001
    bfc_base = jnp.zeros((NUM_CLASSES,), jnp.float32)

    params = {"branch_conv": [], "branches": []}
    br_keys = jax.random.split(k_br, NB)
    for bi, stripe in enumerate(STRIPES):
        P = stripe + 1
        # TODO(synk): real branch backbone (ResNet res_conv4 + layer4) replaced by a
        # 1x1 conv + ReLU stand-in.
        wb = jax.random.normal(br_keys[bi], (C_IN, C_FEAT), jnp.float32) * math.sqrt(2.0 / C_IN)
        params["branch_conv"].append(wb)
        params["branches"].append({
            "wpool": build_pool_weights(stripe),                      # (P, HW)
            "wred": jnp.tile(wred_base[None], (P, 1, 1)),             # deepcopies share init
            "scale": jnp.tile(bn_scale[None], (P, 1)),                # (P, C_RED)
            "shift": jnp.tile(bn_shift[None], (P, 1)),
            "wfc": jnp.tile(wfc_base[None], (P, 1, 1)),               # (P, C_RED, NC)
            "bfc": jnp.tile(bfc_base[None], (P, 1)),                  # (P, NC)
        })
    return params


def fuse_params(params, bt):
    """Build the kernel-ready fused/bf16 weights from the per-branch params."""
    wbcat = jnp.concatenate(params["branch_conv"], axis=1)            # (C_IN, C2)

    # Batch-block-diagonal pooling weight; rows ordered part-major (p*bt + b),
    # columns sample-major (b*HW + s).
    wpool_all = jnp.concatenate([p["wpool"] for p in params["branches"]], axis=0)  # (P_TOTAL, HW)
    eye = jnp.eye(bt, dtype=jnp.float32)
    wpool_bt = jnp.einsum('ps,bc->pbcs', wpool_all, eye).reshape(P_TOTAL * bt, bt * HW)

    wred_rows, shift_rows, wfc_rows, bfc_rows = [], [], [], []
    for bi, stripe in enumerate(STRIPES):
        p = params["branches"][bi]
        for pi in range(stripe + 1):
            # fold the eval-mode BN scale into the reduction weight columns
            wred_rows.append(p["wred"][pi] * p["scale"][pi][None, :])   # (C_FEAT, C_RED)
            shift_rows.append(p["shift"][pi])
            wfc_rows.append(p["wfc"][pi])
            bfc_rows.append(p["bfc"][pi])

    return {
        "wbcat": wbcat.astype(jnp.bfloat16),
        "wpool_bt": wpool_bt.astype(jnp.bfloat16),                    # (P_TOTAL*bt, bt*HW)
        "wred": jnp.stack(wred_rows).astype(jnp.bfloat16),            # (P_TOTAL, C_FEAT, C_RED)
        "shift": jnp.stack(shift_rows),                               # (P_TOTAL, C_RED) f32
        "wfc": jnp.stack(wfc_rows).astype(jnp.bfloat16),              # (P_TOTAL, C_RED, NC)
        "bfc": jnp.stack(bfc_rows),                                   # (P_TOTAL, NC) f32
    }


# ------------------------- forward ----------------------------------------
def mgn_forward(x_nchw, fused, training=False):
    # layout: x is NCHW (PyTorch convention); converted to (B, H*W, C) for the kernel.
    b, c_in, h, w = x_nchw.shape
    assert h == 24, "MGN hardcodes stride = 24 // stripe"
    x = jnp.transpose(x_nchw, (0, 2, 3, 1)).reshape(b, h * w, c_in).astype(jnp.bfloat16)
    slab = mgn_fused_call(x, fused)                       # (b, OUT_PAD) lane-dense slab
    tri = slab[:, :TOTAL_TRI]                             # already the eval concat order
    if not training:
        return tri
    logits_flat = slab[:, TOTAL_TRI:TOTAL_TRI + TOTAL_LOGIT]
    logits = [logits_flat[:, p * NUM_CLASSES:(p + 1) * NUM_CLASSES] for p in range(P_TOTAL)]
    tri_logits, off = [], 0
    for stripe in STRIPES:
        tri_logits.append(tri[:, off:off + C_RED])                            # global feat
        tri_logits.append(tri[:, off + C_RED:off + (stripe + 1) * C_RED])     # cat(locals)
        off += (stripe + 1) * C_RED
    return logits, tri_logits


def mgn_forward_reference(x_nchw, params):
    """Plain-JAX reference (mirrors the kernel's bf16 casts and BN-scale fold)."""
    hp = jax.lax.Precision.HIGHEST

    def bf(a):
        return a.astype(jnp.bfloat16).astype(jnp.float32)

    b, c_in, h, w = x_nchw.shape
    x = bf(jnp.transpose(x_nchw, (0, 2, 3, 1)).reshape(b, h * w, c_in))
    tri_parts, logit_parts = [], []
    for bi, stripe in enumerate(STRIPES):
        wb = bf(params["branch_conv"][bi])
        net = bf(jnp.maximum(jnp.einsum('bsc,cf->bsf', x, wb, precision=hp), 0.0))
        p = params["branches"][bi]
        feats = []
        for pi in range(stripe + 1):
            wpool = bf(p["wpool"][pi])
            pooled = bf(jnp.einsum('bsf,s->bf', net, wpool, precision=hp))
            wred = bf(p["wred"][pi] * p["scale"][pi][None, :])     # BN scale folded, as in kernel
            feat = jnp.dot(pooled, wred, precision=hp) + p["shift"][pi][None, :]
            feats.append(feat)
            logit = jnp.dot(bf(feat), bf(p["wfc"][pi]), precision=hp) + p["bfc"][pi][None, :]
            logit_parts.append(logit)
        tri_parts.append(feats[0])
        tri_parts.append(jnp.concatenate(feats[1:], axis=1))
    return jnp.concatenate(tri_parts, axis=1), logit_parts


if __name__ == "__main__":
    key = jax.random.PRNGKey(0)
    k_x, k_p = jax.random.split(key)
    x = jax.random.normal(k_x, (B, C_IN, H, W), jnp.float32)
    params = init_params(k_p)
    fused = fuse_params(params, BT)

    out = mgn_forward(x, fused, training=False)
    out = jax.block_until_ready(out)

    expected_dim = sum((1 + s) * C_RED for s in STRIPES)
    assert out.shape == (B, expected_dim), out.shape

    ref_tri, ref_logits = mgn_forward_reference(x, params)
    err = float(jnp.max(jnp.abs(out - ref_tri)))
    assert err < 1e-2, f"max abs err {err}"

    # exercise the training path once (same kernel outputs, sliced per part)
    logits, tri_logits = mgn_forward(x, fused, training=True)
    for l in logits:
        jax.block_until_ready(l)
    assert len(logits) == P_TOTAL and len(tri_logits) == 2 * NB
    assert logits[0].shape == (B, NUM_CLASSES)
    lerr = max(float(jnp.max(jnp.abs(a - r))) for a, r in zip(logits, ref_logits))
    assert lerr < 1e-2, f"max abs logit err {lerr}"

    print("KERNEL_OK")
</pallas_src>

<mosaic_0001>
module attributes {stable_mosaic.version = 11 : i64} {
  func.func @_mgn_fused_kernel(%arg0: i32, %arg1: memref<4x192x128xbf16, #tpu.memory_space<vmem>>, %arg2: memref<128x256xbf16, #tpu.memory_space<vmem>>, %arg3: memref<28x768xbf16, #tpu.memory_space<vmem>>, %arg4: memref<7x128x32xbf16, #tpu.memory_space<vmem>>, %arg5: memref<7x32xf32, #tpu.memory_space<vmem>>, %arg6: memref<7x32x16xbf16, #tpu.memory_space<vmem>>, %arg7: memref<7x16xf32, #tpu.memory_space<vmem>>, %arg8: memref<1x4x384xf32, #tpu.memory_space<vmem>>) attributes {dimension_semantics = [#tpu.dimension_semantics<parallel>], iteration_bounds = array<i64: 4>, scalar_prefetch = 0 : i64, scratch_operands = 0 : i64, tpu.core_type = #tpu.core_type<tc>, window_params = [{transform_indices = @transform_0, window_bounds = array<i64: 4, 192, 128>}, {pipeline_mode = #tpu.pipeline_mode<synchronous>, transform_indices = @transform_1, window_bounds = array<i64: 128, 256>}, {pipeline_mode = #tpu.pipeline_mode<synchronous>, transform_indices = @transform_2, window_bounds = array<i64: 28, 768>}, {pipeline_mode = #tpu.pipeline_mode<synchronous>, transform_indices = @transform_3, window_bounds = array<i64: 7, 128, 32>}, {pipeline_mode = #tpu.pipeline_mode<synchronous>, transform_indices = @transform_4, window_bounds = array<i64: 7, 32>}, {pipeline_mode = #tpu.pipeline_mode<synchronous>, transform_indices = @transform_5, window_bounds = array<i64: 7, 32, 16>}, {pipeline_mode = #tpu.pipeline_mode<synchronous>, transform_indices = @transform_6, window_bounds = array<i64: 7, 16>}, {transform_indices = @transform_7, window_bounds = array<i64: 1, 4, 384>}]} {
    %c0 = arith.constant 0 : index
    %c0_0 = arith.constant 0 : index
    %c0_1 = arith.constant 0 : index
    %0 = vector.load %arg1[%c0, %c0_0, %c0_1] : memref<4x192x128xbf16, #tpu.memory_space<vmem>>, vector<4x192x128xbf16>
    %1 = vector.shape_cast %0 : vector<4x192x128xbf16> to vector<768x128xbf16>
    %c0_2 = arith.constant 0 : index
    %c0_3 = arith.constant 0 : index
    %2 = vector.load %arg2[%c0_2, %c0_3] : memref<128x256xbf16, #tpu.memory_space<vmem>>, vector<128x256xbf16>
    %cst = arith.constant dense<0.000000e+00> : vector<768x256xf32>
    %3 = tpu.matmul %1, %2, %cst {dimension_numbers = #tpu.dot_dimension_numbers<[1], [0], [0], [1], [0, 0, 1, 1], [], []>} : vector<768x128xbf16>, vector<128x256xbf16>, vector<768x256xf32> -> vector<768x256xf32>
    %cst_4 = arith.constant 0.000000e+00 : f32
    %4 = vector.broadcast %cst_4 : f32 to vector<768x256xf32>
    %5 = arith.maximumf %3, %4 : vector<768x256xf32>
    %6 = arith.truncf %5 : vector<768x256xf32> to vector<768x256xbf16>
    %c0_5 = arith.constant 0 : index
    %c0_6 = arith.constant 0 : index
    %7 = vector.load %arg3[%c0_5, %c0_6] : memref<28x768xbf16, #tpu.memory_space<vmem>>, vector<28x768xbf16>
    %cst_7 = arith.constant dense<0.000000e+00> : vector<28x256xf32>
    %8 = tpu.matmul %7, %6, %cst_7 {dimension_numbers = #tpu.dot_dimension_numbers<[1], [0], [0], [1], [0, 0, 1, 1], [], []>} : vector<28x768xbf16>, vector<768x256xbf16>, vector<28x256xf32> -> vector<28x256xf32>
    %9 = arith.truncf %8 : vector<28x256xf32> to vector<28x256xbf16>
    %c0_8 = arith.constant 0 : index
    %c0_9 = arith.constant 0 : index
    %10 = vector.load %arg5[%c0_8, %c0_9] : memref<7x32xf32, #tpu.memory_space<vmem>>, vector<7x32xf32>
    %c0_10 = arith.constant 0 : index
    %c0_11 = arith.constant 0 : index
    %11 = vector.load %arg7[%c0_10, %c0_11] : memref<7x16xf32, #tpu.memory_space<vmem>>, vector<7x16xf32>
    %12 = vector.extract_strided_slice %9 {offsets = [0, 0], sizes = [4, 128], strides = [1, 1]} : vector<28x256xbf16> to vector<4x128xbf16>
    %c0_12 = arith.constant 0 : index
    %c0_13 = arith.constant 0 : index
    %c0_14 = arith.constant 0 : index
    %13 = vector.load %arg4[%c0_12, %c0_13, %c0_14] : memref<7x128x32xbf16, #tpu.memory_space<vmem>>, vector<1x128x32xbf16>
    %14 = vector.shape_cast %13 : vector<1x128x32xbf16> to vector<128x32xbf16>
    %cst_15 = arith.constant dense<0.000000e+00> : vector<4x32xf32>
    %15 = tpu.matmul %12, %14, %cst_15 {dimension_numbers = #tpu.dot_dimension_numbers<[1], [0], [0], [1], [0, 0, 1, 1], [], []>} : vector<4x128xbf16>, vector<128x32xbf16>, vector<4x32xf32> -> vector<4x32xf32>
    %16 = vector.extract_strided_slice %10 {offsets = [0, 0], sizes = [1, 32], strides = [1, 1]} : vector<7x32xf32> to vector<1x32xf32>
    %17 = vector.broadcast %16 : vector<1x32xf32> to vector<4x32xf32>
    %18 = arith.addf %15, %17 : vector<4x32xf32>
    %19 = arith.truncf %18 : vector<4x32xf32> to vector<4x32xbf16>
    %c0_16 = arith.constant 0 : index
    %c0_17 = arith.constant 0 : index
    %c0_18 = arith.constant 0 : index
    %20 = vector.load %arg6[%c0_16, %c0_17, %c0_18] : memref<7x32x16xbf16, #tpu.memory_space<vmem>>, vector<1x32x16xbf16>
    %21 = vector.shape_cast %20 : vector<1x32x16xbf16> to vector<32x16xbf16>
    %cst_19 = arith.constant dense<0.000000e+00> : vector<4x16xf32>
    %22 = tpu.matmul %19, %21, %cst_19 {dimension_numbers = #tpu.dot_dimension_numbers<[1], [0], [0], [1], [0, 0, 1, 1], [], []>} : vector<4x32xbf16>, vector<32x16xbf16>, vector<4x16xf32> -> vector<4x16xf32>
    %23 = vector.extract_strided_slice %11 {offsets = [0, 0], sizes = [1, 16], strides = [1, 1]} : vector<7x16xf32> to vector<1x16xf32>
    %24 = vector.broadcast %23 : vector<1x16xf32> to vector<4x16xf32>
    %25 = arith.addf %22, %24 : vector<4x16xf32>
    %26 = vector.extract_strided_slice %9 {offsets = [4, 0], sizes = [4, 128], strides = [1, 1]} : vector<28x256xbf16> to vector<4x128xbf16>
    %c1 = arith.constant 1 : index
    %c0_20 = arith.constant 0 : index
    %c0_21 = arith.constant 0 : index
    %27 = vector.load %arg4[%c1, %c0_20, %c0_21] : memref<7x128x32xbf16, #tpu.memory_space<vmem>>, vector<1x128x32xbf16>
    %28 = vector.shape_cast %27 : vector<1x128x32xbf16> to vector<128x32xbf16>
    %cst_22 = arith.constant dense<0.000000e+00> : vector<4x32xf32>
    %29 = tpu.matmul %26, %28, %cst_22 {dimension_numbers = #tpu.dot_dimension_numbers<[1], [0], [0], [1], [0, 0, 1, 1], [], []>} : vector<4x128xbf16>, vector<128x32xbf16>, vector<4x32xf32> -> vector<4x32xf32>
    %30 = vector.extract_strided_slice %10 {offsets = [1, 0], sizes = [1, 32], strides = [1, 1]} : vector<7x32xf32> to vector<1x32xf32>
    %31 = vector.broadcast %30 : vector<1x32xf32> to vector<4x32xf32>
    %32 = arith.addf %29, %31 : vector<4x32xf32>
    %33 = arith.truncf %32 : vector<4x32xf32> to vector<4x32xbf16>
    %c1_23 = arith.constant 1 : index
    %c0_24 = arith.constant 0 : index
    %c0_25 = arith.constant 0 : index
    %34 = vector.load %arg6[%c1_23, %c0_24, %c0_25] : memref<7x32x16xbf16, #tpu.memory_space<vmem>>, vector<1x32x16xbf16>
    %35 = vector.shape_cast %34 : vector<1x32x16xbf16> to vector<32x16xbf16>
    %cst_26 = arith.constant dense<0.000000e+00> : vector<4x16xf32>
    %36 = tpu.matmul %33, %35, %cst_26 {dimension_numbers = #tpu.dot_dimension_numbers<[1], [0], [0], [1], [0, 0, 1, 1], [], []>} : vector<4x32xbf16>, vector<32x16xbf16>, vector<4x16xf32> -> vector<4x16xf32>
    %37 = vector.extract_strided_slice %11 {offsets = [1, 0], sizes = [1, 16], strides = [1, 1]} : vector<7x16xf32> to vector<1x16xf32>
    %38 = vector.broadcast %37 : vector<1x16xf32> to vector<4x16xf32>
    %39 = arith.addf %36, %38 : vector<4x16xf32>
    %40 = vector.extract_strided_slice %9 {offsets = [8, 0], sizes = [4, 128], strides = [1, 1]} : vector<28x256xbf16> to vector<4x128xbf16>
    %c2 = arith.constant 2 : index
    %c0_27 = arith.constant 0 : index
    %c0_28 = arith.constant 0 : index
    %41 = vector.load %arg4[%c2, %c0_27, %c0_28] : memref<7x128x32xbf16, #tpu.memory_space<vmem>>, vector<1x128x32xbf16>
    %42 = vector.shape_cast %41 : vector<1x128x32xbf16> to vector<128x32xbf16>
    %cst_29 = arith.constant dense<0.000000e+00> : vector<4x32xf32>
    %43 = tpu.matmul %40, %42, %cst_29 {dimension_numbers = #tpu.dot_dimension_numbers<[1], [0], [0], [1], [0, 0, 1, 1], [], []>} : vector<4x128xbf16>, vector<128x32xbf16>, vector<4x32xf32> -> vector<4x32xf32>
    %44 = vector.extract_strided_slice %10 {offsets = [2, 0], sizes = [1, 32], strides = [1, 1]} : vector<7x32xf32> to vector<1x32xf32>
    %45 = vector.broadcast %44 : vector<1x32xf32> to vector<4x32xf32>
    %46 = arith.addf %43, %45 : vector<4x32xf32>
    %47 = arith.truncf %46 : vector<4x32xf32> to vector<4x32xbf16>
    %c2_30 = arith.constant 2 : index
    %c0_31 = arith.constant 0 : index
    %c0_32 = arith.constant 0 : index
    %48 = vector.load %arg6[%c2_30, %c0_31, %c0_32] : memref<7x32x16xbf16, #tpu.memory_space<vmem>>, vector<1x32x16xbf16>
    %49 = vector.shape_cast %48 : vector<1x32x16xbf16> to vector<32x16xbf16>
    %cst_33 = arith.constant dense<0.000000e+00> : vector<4x16xf32>
    %50 = tpu.matmul %47, %49, %cst_33 {dimension_numbers = #tpu.dot_dimension_numbers<[1], [0], [0], [1], [0, 0, 1, 1], [], []>} : vector<4x32xbf16>, vector<32x16xbf16>, vector<4x16xf32> -> vector<4x16xf32>
    %51 = vector.extract_strided_slice %11 {offsets = [2, 0], sizes = [1, 16], strides = [1, 1]} : vector<7x16xf32> to vector<1x16xf32>
    %52 = vector.broadcast %51 : vector<1x16xf32> to vector<4x16xf32>
    %53 = arith.addf %50, %52 : vector<4x16xf32>
    %54 = vector.extract_strided_slice %9 {offsets = [12, 128], sizes = [4, 128], strides = [1, 1]} : vector<28x256xbf16> to vector<4x128xbf16>
    %c3 = arith.constant 3 : index
    %c0_34 = arith.constant 0 : index
    %c0_35 = arith.constant 0 : index
    %55 = vector.load %arg4[%c3, %c0_34, %c0_35] : memref<7x128x32xbf16, #tpu.memory_space<vmem>>, vector<1x128x32xbf16>
    %56 = vector.shape_cast %55 : vector<1x128x32xbf16> to vector<128x32xbf16>
    %cst_36 = arith.constant dense<0.000000e+00> : vector<4x32xf32>
    %57 = tpu.matmul %54, %56, %cst_36 {dimension_numbers = #tpu.dot_dimension_numbers<[1], [0], [0], [1], [0, 0, 1, 1], [], []>} : vector<4x128xbf16>, vector<128x32xbf16>, vector<4x32xf32> -> vector<4x32xf32>
    %58 = vector.extract_strided_slice %10 {offsets = [3, 0], sizes = [1, 32], strides = [1, 1]} : vector<7x32xf32> to vector<1x32xf32>
    %59 = vector.broadcast %58 : vector<1x32xf32> to vector<4x32xf32>
    %60 = arith.addf %57, %59 : vector<4x32xf32>
    %61 = arith.truncf %60 : vector<4x32xf32> to vector<4x32xbf16>
    %c3_37 = arith.constant 3 : index
    %c0_38 = arith.constant 0 : index
    %c0_39 = arith.constant 0 : index
    %62 = vector.load %arg6[%c3_37, %c0_38, %c0_39] : memref<7x32x16xbf16, #tpu.memory_space<vmem>>, vector<1x32x16xbf16>
    %63 = vector.shape_cast %62 : vector<1x32x16xbf16> to vector<32x16xbf16>
    %cst_40 = arith.constant dense<0.000000e+00> : vector<4x16xf32>
    %64 = tpu.matmul %61, %63, %cst_40 {dimension_numbers = #tpu.dot_dimension_numbers<[1], [0], [0], [1], [0, 0, 1, 1], [], []>} : vector<4x32xbf16>, vector<32x16xbf16>, vector<4x16xf32> -> vector<4x16xf32>
    %65 = vector.extract_strided_slice %11 {offsets = [3, 0], sizes = [1, 16], strides = [1, 1]} : vector<7x16xf32> to vector<1x16xf32>
    %66 = vector.broadcast %65 : vector<1x16xf32> to vector<4x16xf32>
    %67 = arith.addf %64, %66 : vector<4x16xf32>
    %68 = vector.extract_strided_slice %9 {offsets = [16, 128], sizes = [4, 128], strides = [1, 1]} : vector<28x256xbf16> to vector<4x128xbf16>
    %c4 = arith.constant 4 : index
    %c0_41 = arith.constant 0 : index
    %c0_42 = arith.constant 0 : index
    %69 = vector.load %arg4[%c4, %c0_41, %c0_42] : memref<7x128x32xbf16, #tpu.memory_space<vmem>>, vector<1x128x32xbf16>
    %70 = vector.shape_cast %69 : vector<1x128x32xbf16> to vector<128x32xbf16>
    %cst_43 = arith.constant dense<0.000000e+00> : vector<4x32xf32>
    %71 = tpu.matmul %68, %70, %cst_43 {dimension_numbers = #tpu.dot_dimension_numbers<[1], [0], [0], [1], [0, 0, 1, 1], [], []>} : vector<4x128xbf16>, vector<128x32xbf16>, vector<4x32xf32> -> vector<4x32xf32>
    %72 = vector.extract_strided_slice %10 {offsets = [4, 0], sizes = [1, 32], strides = [1, 1]} : vector<7x32xf32> to vector<1x32xf32>
    %73 = vector.broadcast %72 : vector<1x32xf32> to vector<4x32xf32>
    %74 = arith.addf %71, %73 : vector<4x32xf32>
    %75 = arith.truncf %74 : vector<4x32xf32> to vector<4x32xbf16>
    %c4_44 = arith.constant 4 : index
    %c0_45 = arith.constant 0 : index
    %c0_46 = arith.constant 0 : index
    %76 = vector.load %arg6[%c4_44, %c0_45, %c0_46] : memref<7x32x16xbf16, #tpu.memory_space<vmem>>, vector<1x32x16xbf16>
    %77 = vector.shape_cast %76 : vector<1x32x16xbf16> to vector<32x16xbf16>
    %cst_47 = arith.constant dense<0.000000e+00> : vector<4x16xf32>
    %78 = tpu.matmul %75, %77, %cst_47 {dimension_numbers = #tpu.dot_dimension_numbers<[1], [0], [0], [1], [0, 0, 1, 1], [], []>} : vector<4x32xbf16>, vector<32x16xbf16>, vector<4x16xf32> -> vector<4x16xf32>
    %79 = vector.extract_strided_slice %11 {offsets = [4, 0], sizes = [1, 16], strides = [1, 1]} : vector<7x16xf32> to vector<1x16xf32>
    %80 = vector.broadcast %79 : vector<1x16xf32> to vector<4x16xf32>
    %81 = arith.addf %78, %80 : vector<4x16xf32>
    %82 = vector.extract_strided_slice %9 {offsets = [20, 128], sizes = [4, 128], strides = [1, 1]} : vector<28x256xbf16> to vector<4x128xbf16>
    %c5 = arith.constant 5 : index
    %c0_48 = arith.constant 0 : index
    %c0_49 = arith.constant 0 : index
    %83 = vector.load %arg4[%c5, %c0_48, %c0_49] : memref<7x128x32xbf16, #tpu.memory_space<vmem>>, vector<1x128x32xbf16>
    %84 = vector.shape_cast %83 : vector<1x128x32xbf16> to vector<128x32xbf16>
    %cst_50 = arith.constant dense<0.000000e+00> : vector<4x32xf32>
    %85 = tpu.matmul %82, %84, %cst_50 {dimension_numbers = #tpu.dot_dimension_numbers<[1], [0], [0], [1], [0, 0, 1, 1], [], []>} : vector<4x128xbf16>, vector<128x32xbf16>, vector<4x32xf32> -> vector<4x32xf32>
    %86 = vector.extract_strided_slice %10 {offsets = [5, 0], sizes = [1, 32], strides = [1, 1]} : vector<7x32xf32> to vector<1x32xf32>
    %87 = vector.broadcast %86 : vector<1x32xf32> to vector<4x32xf32>
    %88 = arith.addf %85, %87 : vector<4x32xf32>
    %89 = arith.truncf %88 : vector<4x32xf32> to vector<4x32xbf16>
    %c5_51 = arith.constant 5 : index
    %c0_52 = arith.constant 0 : index
    %c0_53 = arith.constant 0 : index
    %90 = vector.load %arg6[%c5_51, %c0_52, %c0_53] : memref<7x32x16xbf16, #tpu.memory_space<vmem>>, vector<1x32x16xbf16>
    %91 = vector.shape_cast %90 : vector<1x32x16xbf16> to vector<32x16xbf16>
    %cst_54 = arith.constant dense<0.000000e+00> : vector<4x16xf32>
    %92 = tpu.matmul %89, %91, %cst_54 {dimension_numbers = #tpu.dot_dimension_numbers<[1], [0], [0], [1], [0, 0, 1, 1], [], []>} : vector<4x32xbf16>, vector<32x16xbf16>, vector<4x16xf32> -> vector<4x16xf32>
    %93 = vector.extract_strided_slice %11 {offsets = [5, 0], sizes = [1, 16], strides = [1, 1]} : vector<7x16xf32> to vector<1x16xf32>
    %94 = vector.broadcast %93 : vector<1x16xf32> to vector<4x16xf32>
    %95 = arith.addf %92, %94 : vector<4x16xf32>
    %96 = vector.extract_strided_slice %9 {offsets = [24, 128], sizes = [4, 128], strides = [1, 1]} : vector<28x256xbf16> to vector<4x128xbf16>
    %c6 = arith.constant 6 : index
    %c0_55 = arith.constant 0 : index
    %c0_56 = arith.constant 0 : index
    %97 = vector.load %arg4[%c6, %c0_55, %c0_56] : memref<7x128x32xbf16, #tpu.memory_space<vmem>>, vector<1x128x32xbf16>
    %98 = vector.shape_cast %97 : vector<1x128x32xbf16> to vector<128x32xbf16>
    %cst_57 = arith.constant dense<0.000000e+00> : vector<4x32xf32>
    %99 = tpu.matmul %96, %98, %cst_57 {dimension_numbers = #tpu.dot_dimension_numbers<[1], [0], [0], [1], [0, 0, 1, 1], [], []>} : vector<4x128xbf16>, vector<128x32xbf16>, vector<4x32xf32> -> vector<4x32xf32>
    %100 = vector.extract_strided_slice %10 {offsets = [6, 0], sizes = [1, 32], strides = [1, 1]} : vector<7x32xf32> to vector<1x32xf32>
    %101 = vector.broadcast %100 : vector<1x32xf32> to vector<4x32xf32>
    %102 = arith.addf %99, %101 : vector<4x32xf32>
    %103 = arith.truncf %102 : vector<4x32xf32> to vector<4x32xbf16>
    %c6_58 = arith.constant 6 : index
    %c0_59 = arith.constant 0 : index
    %c0_60 = arith.constant 0 : index
    %104 = vector.load %arg6[%c6_58, %c0_59, %c0_60] : memref<7x32x16xbf16, #tpu.memory_space<vmem>>, vector<1x32x16xbf16>
    %105 = vector.shape_cast %104 : vector<1x32x16xbf16> to vector<32x16xbf16>
    %cst_61 = arith.constant dense<0.000000e+00> : vector<4x16xf32>
    %106 = tpu.matmul %103, %105, %cst_61 {dimension_numbers = #tpu.dot_dimension_numbers<[1], [0], [0], [1], [0, 0, 1, 1], [], []>} : vector<4x32xbf16>, vector<32x16xbf16>, vector<4x16xf32> -> vector<4x16xf32>
    %107 = vector.extract_strided_slice %11 {offsets = [6, 0], sizes = [1, 16], strides = [1, 1]} : vector<7x16xf32> to vector<1x16xf32>
    %108 = vector.broadcast %107 : vector<1x16xf32> to vector<4x16xf32>
    %109 = arith.addf %106, %108 : vector<4x16xf32>
    %cst_62 = arith.constant 0.000000e+00 : f32
    %110 = vector.broadcast %cst_62 : f32 to vector<4x48xf32>
    %111 = tpu.concatenate %18, %32, %46, %60, %74, %88, %102, %25, %39, %53, %67, %81, %95, %109, %110 in 1 : vector<4x32xf32>, vector<4x32xf32>, vector<4x32xf32>, vector<4x32xf32>, vector<4x32xf32>, vector<4x32xf32>, vector<4x32xf32>, vector<4x16xf32>, vector<4x16xf32>, vector<4x16xf32>, vector<4x16xf32>, vector<4x16xf32>, vector<4x16xf32>, vector<4x16xf32>, vector<4x48xf32> -> vector<4x384xf32>
    %c0_63 = arith.constant 0 : index
    %c0_64 = arith.constant 0 : index
    %c0_65 = arith.constant 0 : index
    %112 = vector.load %arg8[%c0_63, %c0_64, %c0_65] : memref<1x4x384xf32, #tpu.memory_space<vmem>>, vector<1x4x384xf32>
    %113 = vector.shape_cast %112 : vector<1x4x384xf32> to vector<4x384xf32>
    %114 = vector.shape_cast %111 : vector<4x384xf32> to vector<1x4x384xf32>
    tpu.vector_store %arg8[%c0_63, %c0_64, %c0_65], %114 {strides = array<i32>} : memref<1x4x384xf32, #tpu.memory_space<vmem>>, vector<1x4x384xf32>,
    return
  }
  func.func @transform_0(%arg0: i32) -> (i32, i32, i32) {
    %c0_i32 = arith.constant 0 : i32
    %c0_i32_0 = arith.constant 0 : i32
    %c0_i32_1 = arith.constant 0 : i32
    return %arg0, %c0_i32, %c0_i32_0 : i32, i32, i32
  }
  func.func @transform_1(%arg0: i32) -> (i32, i32) {
    %c0_i32 = arith.constant 0 : i32
    %c0_i32_0 = arith.constant 0 : i32
    %c0_i32_1 = arith.constant 0 : i32
    return %c0_i32, %c0_i32_0 : i32, i32
  }
  func.func @transform_2(%arg0: i32) -> (i32, i32) {
    %c0_i32 = arith.constant 0 : i32
    %c0_i32_0 = arith.constant 0 : i32
    %c0_i32_1 = arith.constant 0 : i32
    return %c0_i32, %c0_i32_0 : i32, i32
  }
  func.func @transform_3(%arg0: i32) -> (i32, i32, i32) {
    %c0_i32 = arith.constant 0 : i32
    %c0_i32_0 = arith.constant 0 : i32
    %c0_i32_1 = arith.constant 0 : i32
    %c0_i32_2 = arith.constant 0 : i32
    return %c0_i32, %c0_i32_0, %c0_i32_1 : i32, i32, i32
  }
  func.func @transform_4(%arg0: i32) -> (i32, i32) {
    %c0_i32 = arith.constant 0 : i32
    %c0_i32_0 = arith.constant 0 : i32
    %c0_i32_1 = arith.constant 0 : i32
    return %c0_i32, %c0_i32_0 : i32, i32
  }
  func.func @transform_5(%arg0: i32) -> (i32, i32, i32) {
    %c0_i32 = arith.constant 0 : i32
    %c0_i32_0 = arith.constant 0 : i32
    %c0_i32_1 = arith.constant 0 : i32
    %c0_i32_2 = arith.constant 0 : i32
    return %c0_i32, %c0_i32_0, %c0_i32_1 : i32, i32, i32
  }
  func.func @transform_6(%arg0: i32) -> (i32, i32) {
    %c0_i32 = arith.constant 0 : i32
    %c0_i32_0 = arith.constant 0 : i32
    %c0_i32_1 = arith.constant 0 : i32
    return %c0_i32, %c0_i32_0 : i32, i32
  }
  func.func @transform_7(%arg0: i32) -> (i32, i32, i32) {
    %c0_i32 = arith.constant 0 : i32
    %c0_i32_0 = arith.constant 0 : i32
    %c0_i32_1 = arith.constant 0 : i32
    return %arg0, %c0_i32, %c0_i32_0 : i32, i32, i32
  }
}

</mosaic_0001>

<bundles_post_ra>
// kernel: tpu_custom_call.1
= control target key start
LH: loop header
LB: loop body
LE: loop exit
PB: predicated region body
PF: predicated region fallthrough
CT: control target
= control target key end

     0   :  { %12 = vsyncpa [#allocation3], 0  ;;  %s4888_s0 = inlined_call_operand.hbm [shape: bf16[16,192,128], index: 0, kind: input, shape index: {}]   ;;  %s4889_s1 = inlined_call_operand.vmem [shape: bf16[128,256], index: 1, kind: input, shape index: {}]   ;;  %s4890_s2 = inlined_call_operand.vmem [shape: bf16[28,768], index: 2, kind: input, shape index: {}]   ;;  %s4891_s3 = inlined_call_operand.vmem [shape: bf16[7,128,32], index: 3, kind: input, shape index: {}]   ;;  %s4892_s4 = inlined_call_operand.vmem [shape: f32[7,32], index: 4, kind: input, shape index: {}]   ;;  %s4893_s5 = inlined_call_operand.vmem [shape: bf16[7,32,16], index: 5, kind: input, shape index: {}]   ;;  %s4894_s6 = inlined_call_operand.vmem [shape: f32[7,16], index: 6, kind: input, shape index: {}]   ;;  %s4895_s7 = inlined_call_operand.hbm [shape: f32[4,4,384], index: 7, kind: output, shape index: {}]  }
   0x1   :  { %14 = vsyncpa [#allocation3 + $0x1], 0 }
   0x2   :  { %15 = vsyncpa [#allocation4], 0 }
   0x3   :  { %17 = vsyncpa [#allocation4 + $0x1], 0  ;;  %s4146_s24 = smov 0   ;;  %s4148_s25 = smov 0  }
   0x4   :  { %s4150_s26 = smov 0   ;;  %s4152_s27 = smov 0  }
   0x5 LB: > { %s4167_s28 = sadd.s32 4294967295, %s4091_s27   ;;  %s3194_s29 = sadd.s32 4294967294, %s4091_s27   ;;  %s4091_s27 = sphi %s4152_s27, %s4906_s27   ;;  %s4087_s26 = sphi %s4150_s26, %s4905_s26   ;;  %s4083_s25 = sphi %s4148_s25, %s4904_s25   ;;  %s4079_s24 = sphi %s4146_s24, %s4903_s24  }
   0x6   : > { %s4171_s30 = sadd.s32 1, %s4091_s27   ;;  %s30_s8 = sadd.s32 1, %s4087_s26 }
   0x7   : > { %s27_s9 = ssub.s32 %s4091_s27, %s4171_s30  ;;  %p37_p0 = scmp.ne.s32.totalorder %s4087_s26, %s4083_s25 }
   0x8   : > { %p28_p1 = scmp.eq.s32.totalorder %s27_s9, 0  ;;  %p38_p2 = scmp.eq.s32.totalorder %s4091_s27, 0 }
   0x9   : > { %p43_p3 = scmp.ne.s32.totalorder %s4083_s25, %s4079_s24  ;;  %p44_p4 = scmp.eq.s32.totalorder %s4167_s28, 0 }
   0xa   : > { %s4183_s10 = scalar_select %p28_p1, %s4087_s26, %s30_s8  }
   0xb   : > { %p39_p5 = por %p38_p2, %p37_p0  ;;  %p4185_p6 = por %p44_p4, %p43_p3 }
   0xc   : > { %p193_p7 = scmp.eq.s32.totalorder %s4167_s28, 3  ;;  %p199_p8 = scmp.eq.s32.totalorder %s3194_s29, 3 }
   0xd   : > { %p3790_p9 = scmp.lt.s32.totalorder %s4091_s27, 4  ;;  %s237_s14 = sand.u32 1, %s4087_s26  }
   0xe   : > { %p4191_p10 = por %p193_p7, %p37_p0  ;;  %p4195_p11 = por %p199_p8, %p43_p3 }
   0xf   : > { %s3774_s15 = smul.u32 6144, %s4091_s27  ;;  %p4206_p12 = pnand %p3790_p9, %p39_p5 }
  0x10   : > { %s4898_s12 = scalar_select %p4191_p10, 1, 0 }
  0x11   : > { %s4899_s13 = scalar_select %p4195_p11, 1, 0 }
  0x12   : > { %s3773_s16 = smul.u32 384, %s237_s14  ;;  %s4204_s19 = scalar_lea.hbm %s4888_s0, %s3774_s15 }
  0x13   : > { %s4212_s23 = scalar_lea.sflag [#allocation3], %s237_s14  ;;  %s3995_s29 = scalar_lea.hbm %s4204_s19, 6144 }
  0x14   : > { %s241_s21 = scalar_lea.vmem [#allocation2], %s3773_s16  ;;  %p3996_p13 = scmp.ne.s32.totalorder %s4204_s19, %s3995_s29 }
  0x15   : > { %s249_s22 = sshll.u32 %s241_s21, 4  ;;  %p3997_p0 = pneg %p4206_p12  ;;  %s4210_s22 = int_to_ptr.vmem [resolvable:$true] %s249_s22 }
  0x16   : > { %s4000_s15 = scalar_lea.hbm %s4888_s0, 24576  ;;  %p4001_p3 = scmp.lt.u32.totalorder %s4204_s19, %s4888_s0 }
  0x17   : > { %p3998_p1 = pnand %p3997_p0, %p3996_p13  ;;  %p4002_p4 = scmp.lt.u32.totalorder %s4000_s15, %s3995_s29 }
  0x18   : > { %p4004_p7 = scmp.lt.u32.totalorder %s3995_s29, %s4204_s19 }
  0x19   : > { %p3999_p2 = pneg %p3998_p1  ;;  %p4003_p5 = por %p4002_p4, %p4001_p3 }
  0x1b   : > { %p4005_p8 = por %p4004_p7, %p4003_p5 }
  0x1d   : > { %p4006_p9 = pnand %p4005_p8, %p3999_p2 }
  0x1f   : > { %4009 = shalt.err (!%p4006_p9)
}
  0x20   : > { %s4010_s14 = scalar_lea.vmem %s4210_s22, 6144  ;;  %s4093_s16 = smov [#allocation2]  }
  0x21   : > { %p4011_p13 = scmp.ne.s32.totalorder %s4210_s22, %s4010_s14  ;;  %s4015_s21 = sshll.u32 %s4093_s16, 4  ;;  %s4016_s21 = int_to_ptr.vmem [resolvable:$false] %s4015_s21 }
  0x22   : > { %s4017_s8 = scalar_lea.vmem %s4016_s21, 12288  ;;  %p4018_p10 = scmp.lt.s32.totalorder %s4210_s22, %s4016_s21 }
  0x23   : > { %p4013_p1 = pnand %p4011_p13, %p3997_p0  ;;  %p4019_p3 = scmp.lt.s32.totalorder %s4017_s8, %s4010_s14 }
  0x25   : > { %p4014_p11 = pneg %p4013_p1  ;;  %p4020_p4 = por %p4019_p3, %p4018_p10 }
  0x27   : > { %p4021_p5 = pnand %p4020_p4, %p4014_p11 }
  0x29   : > { %4024 = shalt.err (!%p4021_p5)
}
  0x2a   : > { %s4094_s29 = smov 64   ;;  %s4095_s9 = smov 4  }
  0x2b   : > { %3785 = dma.hbm_to_vmem [thread:$0]  (!%p4206_p12), %s4204_s19, 6144, %s4210_s22, %s4212_s23, %s4094_s29, %s4094_s29, %s4095_s9  }
  0x2c   : > { %p3200_p0 = scmp.ge.s32.totalorder %s4091_s27, 1  ;;  %p257_p2 = scmp.lt.s32.totalorder %s4091_s27, 5 }
  0x2e   : > { %p258_p7 = pnand %p3200_p0, %p257_p2 }
  0x2f   : > { %s4243_s15 = sand.u32 (!%p258_p7), 1, %s4083_s25  }
  0x30   : > { %261 = sbr.rel (%p258_p7) target bundleno = 2713 (0xa99), region = 48  ;;  %s264_s18 = scalar_lea.sflag (!%p258_p7), [#allocation3], %s4243_s15 }
  0x31   : > { %s3775_s17 = smul.u32 (!%p258_p7), 384, %s4243_s15 }
  0x33   : > { %s4247_s14 = scalar_lea.vmem (!%p258_p7), [#allocation2], %s3775_s17 }
  0x37   : > { %4070 = dma.done.wait (%p4185_p6), %s264_s18, 6144  }
  0x38   : > { %4072 = vsyncadd (%p4185_p6), %s264_s18, 4294961152  ;;  %v4096_v0 = vmov 0   ;;  %v3835_v1 = vld [vmem:[%s4889_s1 + $0x4] ss:$8 sps:$4 sm:$0xff]   ;;  %v3837_v2 = vld [vmem:[%s4889_s1] ss:$8 sps:$4 sm:$0xff]  }
  0x39   : > { %812 = vmatprep.mubr.bf16.mxu0 %v4096_v0  ;;  %780 = vmatprep.subr.bf16.mxu0 %v3835_v1  ;;  %v3838_v3 = vld [vmem:[%s4889_s1 + $0x14] ss:$8 sps:$4 sm:$0xff]   ;;  %v3840_v4 = vld [vmem:[%s4889_s1 + $0x10] ss:$8 sps:$4 sm:$0xff]   ;;  %v3841_v5 = vld [vmem:[%s4889_s1 + $0x24] ss:$8 sps:$4 sm:$0xff]  }
  0x3a   : > { %781 = vmatpush1.bf16.msra.mxu0 %v3837_v2  ;;  %v3843_v6 = vld [vmem:[%s4889_s1 + $0x20] ss:$8 sps:$4 sm:$0xff]   ;;  %v3844_v7 = vld [vmem:[%s4889_s1 + $0x34] ss:$8 sps:$4 sm:$0xff]   ;;  %v3846_v8 = vld [vmem:[%s4889_s1 + $0x30] ss:$8 sps:$4 sm:$0xff]  }
  0x3b   : > { %782 = vmatprep.subr.bf16.mxu0 %v3838_v3  ;;  %v3847_v9 = vld [vmem:[%s4889_s1 + $0x44] ss:$8 sps:$4 sm:$0xff]   ;;  %v3849_v10 = vld [vmem:[%s4889_s1 + $0x40] ss:$8 sps:$4 sm:$0xff]   ;;  %v3850_v11 = vld [vmem:[%s4889_s1 + $0x54] ss:$8 sps:$4 sm:$0xff]  }
  0x3c   : > { %v3852_v12 = vld [vmem:[%s4889_s1 + $0x50] ss:$8 sps:$4 sm:$0xff]   ;;  %v3853_v13 = vld [vmem:[%s4889_s1 + $0x64] ss:$8 sps:$4 sm:$0xff]   ;;  %v3855_v14 = vld [vmem:[%s4889_s1 + $0x60] ss:$8 sps:$4 sm:$0xff]  }
  0x3d   : > { %v3856_v15 = vld [vmem:[%s4889_s1 + $0x74] ss:$8 sps:$4 sm:$0xff]   ;;  %v3858_v16 = vld [vmem:[%s4889_s1 + $0x70] ss:$8 sps:$4 sm:$0xff]   ;;  %v3859_v17 = vld [vmem:[%s4247_s14] sm:$0xff]   ;;  %vm4098_vm0 = vmmov 0  }
  0x3e   : > { %783 = vmatpush1.bf16.msra.mxu0 %v3840_v4  ;;  %v3860_v18 = vld [vmem:[%s4247_s14 + $0x8] sm:$0xff]   ;;  %v3861_v19 = vld [vmem:[%s4247_s14 + $0x10] sm:$0xff]   ;;  %v3862_v20 = vld [vmem:[%s4247_s14 + $0x18] sm:$0xff]   ;;  %vm1940_vm1 = vcmask 261120   ;;  %s4099_s18 = smov 32   ;;  %s4100_s16 = smov 96  }
  0x3f   : > { %784 = vmatprep.subr.bf16.mxu0 %v3841_v5  ;;  %v3863_v21 = vld [vmem:[%s4247_s14 + $0x20] sm:$0xff]   ;;  %v3864_v22 = vld [vmem:[%s4247_s14 + $0x28] sm:$0xff]   ;;  %v3865_v23 = vld [vmem:[%s4247_s14 + $0x30] sm:$0xff]   ;;  %s4101_s22 = smov 112   ;;  %s4103_s20 = smov 16   ;;  %vm3086_vm2 = vcmask 523264  }
  0x40   : > { %v3866_v24 = vld [vmem:[%s4247_s14 + $0x38] sm:$0xff]   ;;  %v3867_v25 = vld [vmem:[%s4247_s14 + $0x40] sm:$0xff]   ;;  %v3868_v26 = vld [vmem:[%s4247_s14 + $0x48] sm:$0xff]   ;;  %s3776_s21 = smul.u32 12, %s4243_s15  ;;  %vm3088_vm3 = vcmask 785408   ;;  %vm3093_vm4 = vcmask 916480  }
  0x41   : > { %v3869_v27 = vld [vmem:[%s4247_s14 + $0x50] sm:$0xff]   ;;  %v3870_v28 = vld [vmem:[%s4247_s14 + $0x58] sm:$0xff]   ;;  %v3871_v29 = vld [vmem:[%s4247_s14 + $0x60] sm:$0xff]   ;;  %vm3095_vm5 = vcmask 130048   ;;  %vm3098_vm6 = vcmask 392192   ;;  %s3777_s11 = smul.u32 192, %s4167_s28 }
  0x42   : > { %785 = vmatpush1.bf16.msra.mxu0 %v3843_v6  ;;  %v3872_v30 = vld [vmem:[%s4247_s14 + $0x68] sm:$0xff]   ;;  %v3873_v31 = vld [vmem:[%s4247_s14 + $0x70] sm:$0xff]   ;;  %v3874_v32 = vld [vmem:[%s4247_s14 + $0x78] sm:$0xff]   ;;  %s297_s8 = scalar_lea.vmem [#allocation5], %s3776_s21  ;;  %vm3101_vm7 = vcmask 654336   ;;  %s3110_s28 = scalar_lea.sflag [#allocation4], %s4243_s15 }
  0x43   : > { %786 = vmatprep.subr.bf16.mxu0 %v3844_v7  ;;  %v3875_v33 = vld [vmem:[%s4247_s14 + $0x80] sm:$0xff]   ;;  %v3876_v34 = vld [vmem:[%s4247_s14 + $0x88] sm:$0xff]   ;;  %v3877_v35 = vld [vmem:[%s4247_s14 + $0x90] sm:$0xff]   ;;  %s3124_s29 = sshll.u32 %s297_s8, 4  ;;  %p4901_p10 = scmp.ne.s32.totalorder %s4898_s12, 0  ;;  %s4847_s29 = int_to_ptr.vmem [resolvable:$true] %s3124_s29 }
  0x44   : > { %v3878_v36 = vld [vmem:[%s4247_s14 + $0x98] sm:$0xff]   ;;  %v3879_v37 = vld [vmem:[%s4247_s14 + $0xa0] sm:$0xff]   ;;  %v3880_v38 = vld [vmem:[%s4247_s14 + $0xa8] sm:$0xff]   ;;  %s4025_s17 = scalar_lea.vmem %s4847_s29, 192  ;;  %s4105_s19 = smov [#allocation5]  }
  0x45   : > { %v3881_v39 = vld [vmem:[%s4247_s14 + $0xb0] sm:$0xff]   ;;  %v3882_v40 = vld [vmem:[%s4247_s14 + $0xb8] sm:$0xff]   ;;  %v3883_v41 = vld [vmem:[%s4247_s14 + $0xc0] sm:$0xff]   ;;  %p4026_p6 = scmp.ne.s32.totalorder %s4847_s29, %s4025_s17 }
  0x46   : > { %787 = vmatpush1.bf16.msra.mxu0 %v3846_v8  ;;  %v3884_v42 = vld [vmem:[%s4247_s14 + $0xc8] sm:$0xff]   ;;  %v3885_v43 = vld [vmem:[%s4247_s14 + $0xd0] sm:$0xff]   ;;  %v3886_v46 = vld [vmem:[%s4247_s14 + $0xd8] sm:$0xff]  }
  0x47   : > { %788 = vmatprep.subr.bf16.mxu0 %v3847_v9  ;;  %v3905_v55 = vld [vmem:[%s4890_s2 + $0x4] ss:$24 sps:$4 sm:$0xff]   ;;  %v3888_v6 = vld [vmem:[%s4247_s14 + $0xe8] sm:$0xff]   ;;  %p4027_p11 = pnand %p4026_p6, %p4901_p10 }
  0x48   : > { %1685 = vmatprep.mubr.bf16.mxu1 %v3905_v55  ;;  %v3887_v58 = vld [vmem:[%s4247_s14 + $0xe0] sm:$0xff]  }
  0x49   : > { %p4028_p12 = pneg %p4027_p11 }
  0x4a   : > { %789 = vmatpush1.bf16.msra.mxu0 %v3849_v10 }
  0x4b   : > { %790 = vmatprep.subr.bf16.mxu0 %v3850_v11 }
  0x4e   : > { %791 = vmatpush1.bf16.msra.mxu0 %v3852_v12 }
  0x4f   : > { %792 = vmatprep.subr.bf16.mxu0 %v3853_v13 }
  0x52   : > { %793 = vmatpush1.bf16.msra.mxu0 %v3855_v14 }
  0x53   : > { %794 = vmatprep.subr.bf16.mxu0 %v3856_v15 }
  0x56   : > { %795 = vmatpush1.bf16.msra.mxu0 %v3858_v16 }
  0x59   : > { %813 = vmatmul.mubr.bf16.vlgmr.msra.gmra.mrb[0].mxu0 %v3859_v17  ;;  %v3889_v17 = vld [vmem:[%s4247_s14 + $0xf0] sm:$0xff]  }
  0x5a   : > { %822 = vmatprep.mubr.bf16.mxu0 %v4096_v0 }
  0x61   : > { %823 = vmatmul.mubr.bf16.gmra.mrb[4].mxu0 %v3860_v18 }
  0x62   : > { %832 = vmatprep.mubr.bf16.mxu0 %v4096_v0 }
  0x69   : > { %833 = vmatmul.mubr.bf16.gmra.mrb[8].mxu0 %v3861_v19 }
  0x6a   : > { %842 = vmatprep.mubr.bf16.mxu0 %v4096_v0 }
  0x71   : > { %843 = vmatmul.mubr.bf16.gmra.mrb[12].mxu0 %v3862_v20 }
  0x72   : > { %852 = vmatprep.mubr.bf16.mxu0 %v4096_v0 }
  0x79   : > { %853 = vmatmul.mubr.bf16.gmra.mrb[16].mxu0 %v3863_v21 }
  0x7a   : > { %862 = vmatprep.mubr.bf16.mxu0 %v4096_v0 }
  0x81   : > { %863 = vmatmul.mubr.bf16.gmra.mrb[20].mxu0 %v3864_v22 }
  0x82   : > { %872 = vmatprep.mubr.bf16.mxu0 %v4096_v0 }
  0x89   : > { %873 = vmatmul.mubr.bf16.gmra.mrb[24].mxu0 %v3865_v23 }
  0x8a   : > { %882 = vmatprep.mubr.bf16.mxu0 %v4096_v0 }
  0x91   : > { %883 = vmatmul.mubr.bf16.gmra.mrb[28].mxu0 %v3866_v24 }
  0x92   : > { %892 = vmatprep.mubr.bf16.mxu0 %v4096_v0 }
  0x99   : > { %893 = vmatmul.mubr.bf16.gmra.mrb[32].mxu0 %v3867_v25 }
  0x9a   : > { %902 = vmatprep.mubr.bf16.mxu0 %v4096_v0 }
  0xa1   : > { %903 = vmatmul.mubr.bf16.gmra.mrb[36].mxu0 %v3868_v26 }
  0xa2   : > { %912 = vmatprep.mubr.bf16.mxu0 %v4096_v0 }
  0xa9   : > { %913 = vmatmul.mubr.bf16.gmra.mrb[40].mxu0 %v3869_v27 }
  0xaa   : > { %922 = vmatprep.mubr.bf16.mxu0 %v4096_v0 }
  0xb1   : > { %923 = vmatmul.mubr.bf16.gmra.mrb[44].mxu0 %v3870_v28  ;;  %v3890_v28 = vld [vmem:[%s4247_s14 + $0xf8] sm:$0xff]  }
  0xb2   : > { %932 = vmatprep.mubr.bf16.mxu0 %v4096_v0 }
  0xb9   : > { %933 = vmatmul.mubr.bf16.gmra.mrb[48].mxu0 %v3871_v29 }
  0xba   : > { %942 = vmatprep.mubr.bf16.mxu0 %v4096_v0 }
  0xc1   : > { %943 = vmatmul.mubr.bf16.gmra.mrb[52].mxu0 %v3872_v30 }
  0xc2   : > { %952 = vmatprep.mubr.bf16.mxu0 %v4096_v0 }
  0xc9   : > { %953 = vmatmul.mubr.bf16.gmra.mrb[56].mxu0 %v3873_v31 }
  0xca   : > { %962 = vmatprep.mubr.bf16.mxu0 %v4096_v0 }
  0xd1   : > { %963 = vmatmul.mubr.bf16.gmra.mrb[60].mxu0 %v3874_v32 }
  0xd2   : > { %972 = vmatprep.mubr.bf16.mxu0 %v4096_v0 }
  0xd9   : > { %973 = vmatmul.mubr.bf16.gmra.mrb[64].mxu0 %v3875_v33 }
  0xda   : > { %982 = vmatprep.mubr.bf16.mxu0 %v4096_v0 }
  0xe1   : > { %983 = vmatmul.mubr.bf16.gmra.mrb[68].mxu0 %v3876_v34 }
  0xe2   : > { %992 = vmatprep.mubr.bf16.mxu0 %v4096_v0 }
  0xe9   : > { %993 = vmatmul.mubr.bf16.gmra.mrb[72].mxu0 %v3877_v35 }
  0xea   : > { %1002 = vmatprep.mubr.bf16.mxu0 %v4096_v0 }
  0xf1   : > { %1003 = vmatmul.mubr.bf16.gmra.mrb[76].mxu0 %v3878_v36 }
  0xf2   : > { %1012 = vmatprep.mubr.bf16.mxu0 %v4096_v0 }
  0xf9   : > { %1013 = vmatmul.mubr.bf16.gmra.mrb[80].mxu0 %v3879_v37 }
  0xfa   : > { %1022 = vmatprep.mubr.bf16.mxu0 %v4096_v0 }
 0x101   : > { %1023 = vmatmul.mubr.bf16.gmra.mrb[84].mxu0 %v3880_v38 }
 0x102   : > { %1032 = vmatprep.mubr.bf16.mxu0 %v4096_v0 }
 0x109   : > { %1033 = vmatmul.mubr.bf16.gmra.mrb[88].mxu0 %v3881_v39  ;;  %v3891_v39 = vld [vmem:[%s4247_s14 + $0x100] sm:$0xff]  }
 0x10a   : > { %1042 = vmatprep.mubr.bf16.mxu0 %v4096_v0 }
 0x111   : > { %1043 = vmatmul.mubr.bf16.gmra.mrb[92].mxu0 %v3882_v40 }
 0x112   : > { %1052 = vmatprep.mubr.bf16.mxu0 %v4096_v0 }
 0x119   : > { %1053 = vmatmul.mubr.bf16.gmra.mrb[96].mxu0 %v3883_v41 }
 0x11a   : > { %1062 = vmatprep.mubr.bf16.mxu0 %v4096_v0 }
 0x121   : > { %1063 = vmatmul.mubr.bf16.gmra.mrb[100].mxu0 %v3884_v42 }
 0x122   : > { %1072 = vmatprep.mubr.bf16.mxu0 %v4096_v0 }
 0x129   : > { %1073 = vmatmul.mubr.bf16.gmra.mrb[104].mxu0 %v3885_v43 }
 0x12a   : > { %1082 = vmatprep.mubr.bf16.mxu0 %v4096_v0 }
 0x12c   : > { %v814_v44 = vpop.f32.mrb[0].mxu0 }
 0x12d   : > { %v816_v45 = vpop.f32.mrb[1].mxu0  ;;  %v1293_v48 = vmax.f32 %v814_v44, 0.0 }
 0x12e   : > { %v818_v47 = vpop.f32.mrb[2].mxu0  ;;  %v1294_v51 = vmax.f32 %v816_v45, 0.0 }
 0x12f   : > { %v1295_v49 = vmax.f32 %v818_v47, 0.0  ;;  %v820_v50 = vpop.f32.mrb[3].mxu0 }
 0x130   : > { %v1296_v52 = vmax.f32 %v820_v50, 0.0  ;;  %v3892_v50 = vld [vmem:[%s4247_s14 + $0x108] sm:$0xff]  }
 0x131   : > { %1083 = vmatmul.mubr.bf16.gmra.mrb[108].mxu0 %v3886_v46  ;;  %v1485_v53 = vpack.c.bf16 %v1295_v49, %v1293_v48 }
 0x132   : > { %v1486_v54 = vpack.c.bf16 %v1296_v52, %v1294_v51  ;;  %1092 = vmatprep.mubr.bf16.mxu0 %v4096_v0 }
 0x134   : > { %v824_v56 = vpop.f32.mrb[4].mxu0  ;;  %1653 = vmatprep.subr.bf16.mxu1 %v1486_v54 }
 0x135   : > { %v826_v57 = vpop.f32.mrb[5].mxu0  ;;  %1654 = vmatpush1.bf16.msra.mxu1 %v1485_v53  ;;  %v1297_v60 = vmax.f32 %v824_v56, 0.0 }
 0x136   : > { %v828_v59 = vpop.f32.mrb[6].mxu0  ;;  %v1298_v63 = vmax.f32 %v826_v57, 0.0 }
 0x137   : > { %v1299_v61 = vmax.f32 %v828_v59, 0.0  ;;  %v830_v62 = vpop.f32.mrb[7].mxu0 }
 0x138   : > { %v1300_v1 = vmax.f32 %v830_v62, 0.0 }
 0x139   : > { %v1487_v2 = vpack.c.bf16 %v1299_v61, %v1297_v60  ;;  %1093 = vmatmul.mubr.bf16.gmra.mrb[112].mxu0 %v3887_v58  ;;  %v3893_v61 = vld [vmem:[%s4247_s14 + $0x110] sm:$0xff]  }
 0x13a   : > { %v1488_v3 = vpack.c.bf16 %v1300_v1, %v1298_v63  ;;  %1102 = vmatprep.mubr.bf16.mxu0 %v4096_v0 }
 0x13c   : > { %v834_v4 = vpop.f32.mrb[8].mxu0  ;;  %1655 = vmatprep.subr.bf16.mxu1 %v1488_v3 }
 0x13d   : > { %v836_v5 = vpop.f32.mrb[9].mxu0  ;;  %1656 = vmatpush1.bf16.msra.mxu1 %v1487_v2  ;;  %v1301_v8 = vmax.f32 %v834_v4, 0.0 }
 0x13e   : > { %v838_v7 = vpop.f32.mrb[10].mxu0  ;;  %v1302_v11 = vmax.f32 %v836_v5, 0.0 }
 0x13f   : > { %v1303_v9 = vmax.f32 %v838_v7, 0.0  ;;  %v840_v10 = vpop.f32.mrb[11].mxu0 }
 0x140   : > { %v1304_v12 = vmax.f32 %v840_v10, 0.0 }
 0x141   : > { %v1489_v13 = vpack.c.bf16 %v1303_v9, %v1301_v8  ;;  %1103 = vmatmul.mubr.bf16.gmra.mrb[116].mxu0 %v3888_v6  ;;  %v3894_v9 = vld [vmem:[%s4247_s14 + $0x118] sm:$0xff]  }
 0x142   : > { %v1490_v14 = vpack.c.bf16 %v1304_v12, %v1302_v11  ;;  %1112 = vmatprep.mubr.bf16.mxu0 %v4096_v0 }
 0x144   : > { %v844_v15 = vpop.f32.mrb[12].mxu0  ;;  %1657 = vmatprep.subr.bf16.mxu1 %v1490_v14 }
 0x145   : > { %v846_v16 = vpop.f32.mrb[13].mxu0  ;;  %1658 = vmatpush1.bf16.msra.mxu1 %v1489_v13  ;;  %v1305_v19 = vmax.f32 %v844_v15, 0.0 }
 0x146   : > { %v848_v18 = vpop.f32.mrb[14].mxu0  ;;  %v1306_v22 = vmax.f32 %v846_v16, 0.0 }
 0x147   : > { %v1307_v20 = vmax.f32 %v848_v18, 0.0  ;;  %v850_v21 = vpop.f32.mrb[15].mxu0 }
 0x148   : > { %v1308_v23 = vmax.f32 %v850_v21, 0.0 }
 0x149   : > { %v1491_v24 = vpack.c.bf16 %v1307_v20, %v1305_v19  ;;  %1113 = vmatmul.mubr.bf16.gmra.mrb[120].mxu0 %v3889_v17  ;;  %v3895_v20 = vld [vmem:[%s4247_s14 + $0x120] sm:$0xff]  }
 0x14a   : > { %v1492_v25 = vpack.c.bf16 %v1308_v23, %v1306_v22  ;;  %1122 = vmatprep.mubr.bf16.mxu0 %v4096_v0 }
 0x14c   : > { %v854_v26 = vpop.f32.mrb[16].mxu0  ;;  %1659 = vmatprep.subr.bf16.mxu1 %v1492_v25 }
 0x14d   : > { %v856_v27 = vpop.f32.mrb[17].mxu0  ;;  %1660 = vmatpush1.bf16.msra.mxu1 %v1491_v24  ;;  %v1309_v30 = vmax.f32 %v854_v26, 0.0 }
 0x14e   : > { %v858_v29 = vpop.f32.mrb[18].mxu0  ;;  %v1310_v33 = vmax.f32 %v856_v27, 0.0 }
 0x14f   : > { %v1311_v31 = vmax.f32 %v858_v29, 0.0  ;;  %v860_v32 = vpop.f32.mrb[19].mxu0 }
 0x150   : > { %v1312_v34 = vmax.f32 %v860_v32, 0.0 }
 0x151   : > { %v1493_v35 = vpack.c.bf16 %v1311_v31, %v1309_v30  ;;  %1123 = vmatmul.mubr.bf16.gmra.mrb[124].mxu0 %v3890_v28  ;;  %v3896_v31 = vld [vmem:[%s4247_s14 + $0x128] sm:$0xff]  }
 0x152   : > { %v1494_v36 = vpack.c.bf16 %v1312_v34, %v1310_v33  ;;  %1132 = vmatprep.mubr.bf16.mxu0 %v4096_v0 }
 0x154   : > { %v864_v37 = vpop.f32.mrb[20].mxu0  ;;  %1661 = vmatprep.subr.bf16.mxu1 %v1494_v36 }
 0x155   : > { %v866_v38 = vpop.f32.mrb[21].mxu0  ;;  %1662 = vmatpush1.bf16.msra.mxu1 %v1493_v35  ;;  %v1313_v41 = vmax.f32 %v864_v37, 0.0 }
 0x156   : > { %v868_v40 = vpop.f32.mrb[22].mxu0  ;;  %v1314_v44 = vmax.f32 %v866_v38, 0.0 }
 0x157   : > { %v1315_v42 = vmax.f32 %v868_v40, 0.0  ;;  %v870_v43 = vpop.f32.mrb[23].mxu0 }
 0x158   : > { %v1316_v45 = vmax.f32 %v870_v43, 0.0 }
 0x159   : > { %v1495_v46 = vpack.c.bf16 %v1315_v42, %v1313_v41  ;;  %1133 = vmatmul.mubr.bf16.gmra.mrb[128].mxu0 %v3891_v39  ;;  %v3897_v42 = vld [vmem:[%s4247_s14 + $0x130] sm:$0xff]  }
 0x15a   : > { %v1496_v47 = vpack.c.bf16 %v1316_v45, %v1314_v44  ;;  %1142 = vmatprep.mubr.bf16.mxu0 %v4096_v0 }
 0x15c   : > { %v874_v48 = vpop.f32.mrb[24].mxu0  ;;  %1663 = vmatprep.subr.bf16.mxu1 %v1496_v47 }
 0x15d   : > { %v876_v49 = vpop.f32.mrb[25].mxu0  ;;  %1664 = vmatpush1.bf16.msra.mxu1 %v1495_v46  ;;  %v1317_v52 = vmax.f32 %v874_v48, 0.0 }
 0x15e   : > { %v878_v51 = vpop.f32.mrb[26].mxu0  ;;  %v1318_v55 = vmax.f32 %v876_v49, 0.0 }
 0x15f   : > { %v1319_v53 = vmax.f32 %v878_v51, 0.0  ;;  %v880_v54 = vpop.f32.mrb[27].mxu0 }
 0x160   : > { %v1320_v56 = vmax.f32 %v880_v54, 0.0 }
 0x161   : > { %v1497_v57 = vpack.c.bf16 %v1319_v53, %v1317_v52  ;;  %1143 = vmatmul.mubr.bf16.gmra.mrb[132].mxu0 %v3892_v50  ;;  %v3898_v53 = vld [vmem:[%s4247_s14 + $0x138] sm:$0xff]  }
 0x162   : > { %v1498_v58 = vpack.c.bf16 %v1320_v56, %v1318_v55  ;;  %1152 = vmatprep.mubr.bf16.mxu0 %v4096_v0 }
 0x164   : > { %v884_v59 = vpop.f32.mrb[28].mxu0  ;;  %1665 = vmatprep.subr.bf16.mxu1 %v1498_v58 }
 0x165   : > { %v886_v60 = vpop.f32.mrb[29].mxu0  ;;  %1666 = vmatpush1.bf16.msra.mxu1 %v1497_v57  ;;  %v1321_v63 = vmax.f32 %v884_v59, 0.0 }
 0x166   : > { %v888_v62 = vpop.f32.mrb[30].mxu0  ;;  %v1322_v3 = vmax.f32 %v886_v60, 0.0 }
 0x167   : > { %v1323_v1 = vmax.f32 %v888_v62, 0.0  ;;  %v890_v2 = vpop.f32.mrb[31].mxu0 }
 0x168   : > { %v1324_v4 = vmax.f32 %v890_v2, 0.0 }
 0x169   : > { %v1499_v5 = vpack.c.bf16 %v1323_v1, %v1321_v63  ;;  %1153 = vmatmul.mubr.bf16.gmra.mrb[136].mxu0 %v3893_v61  ;;  %v3899_v1 = vld [vmem:[%s4247_s14 + $0x140] sm:$0xff]  }
 0x16a   : > { %v1500_v6 = vpack.c.bf16 %v1324_v4, %v1322_v3  ;;  %1162 = vmatprep.mubr.bf16.mxu0 %v4096_v0 }
 0x16c   : > { %v894_v7 = vpop.f32.mrb[32].mxu0  ;;  %1667 = vmatprep.subr.bf16.mxu1 %v1500_v6 }
 0x16d   : > { %v896_v8 = vpop.f32.mrb[33].mxu0  ;;  %1668 = vmatpush1.bf16.msra.mxu1 %v1499_v5  ;;  %v1325_v11 = vmax.f32 %v894_v7, 0.0 }
 0x16e   : > { %v898_v10 = vpop.f32.mrb[34].mxu0  ;;  %v1326_v14 = vmax.f32 %v896_v8, 0.0 }
 0x16f   : > { %v1327_v12 = vmax.f32 %v898_v10, 0.0  ;;  %v900_v13 = vpop.f32.mrb[35].mxu0 }
 0x170   : > { %v1328_v15 = vmax.f32 %v900_v13, 0.0 }
 0x171   : > { %v1501_v16 = vpack.c.bf16 %v1327_v12, %v1325_v11  ;;  %1163 = vmatmul.mubr.bf16.gmra.mrb[140].mxu0 %v3894_v9  ;;  %v3900_v12 = vld [vmem:[%s4247_s14 + $0x148] sm:$0xff]  }
 0x172   : > { %v1502_v17 = vpack.c.bf16 %v1328_v15, %v1326_v14  ;;  %1172 = vmatprep.mubr.bf16.mxu0 %v4096_v0 }
 0x174   : > { %v904_v18 = vpop.f32.mrb[36].mxu0  ;;  %1669 = vmatprep.subr.bf16.mxu1 %v1502_v17 }
 0x175   : > { %v906_v19 = vpop.f32.mrb[37].mxu0  ;;  %1670 = vmatpush1.bf16.msra.mxu1 %v1501_v16  ;;  %v1329_v22 = vmax.f32 %v904_v18, 0.0 }
 0x176   : > { %v908_v21 = vpop.f32.mrb[38].mxu0  ;;  %v1330_v25 = vmax.f32 %v906_v19, 0.0 }
 0x177   : > { %v1331_v23 = vmax.f32 %v908_v21, 0.0  ;;  %v910_v24 = vpop.f32.mrb[39].mxu0 }
 0x178   : > { %v1332_v26 = vmax.f32 %v910_v24, 0.0 }
 0x179   : > { %v1503_v27 = vpack.c.bf16 %v1331_v23, %v1329_v22  ;;  %1173 = vmatmul.mubr.bf16.gmra.mrb[144].mxu0 %v3895_v20  ;;  %v3901_v23 = vld [vmem:[%s4247_s14 + $0x150] sm:$0xff]  }
 0x17a   : > { %v1504_v28 = vpack.c.bf16 %v1332_v26, %v1330_v25  ;;  %1182 = vmatprep.mubr.bf16.mxu0 %v4096_v0 }
 0x17c   : > { %v914_v29 = vpop.f32.mrb[40].mxu0  ;;  %1671 = vmatprep.subr.bf16.mxu1 %v1504_v28 }
 0x17d   : > { %v916_v30 = vpop.f32.mrb[41].mxu0  ;;  %1672 = vmatpush1.bf16.msra.mxu1 %v1503_v27  ;;  %v1333_v33 = vmax.f32 %v914_v29, 0.0 }
 0x17e   : > { %v918_v32 = vpop.f32.mrb[42].mxu0  ;;  %v1334_v36 = vmax.f32 %v916_v30, 0.0 }
 0x17f   : > { %v1335_v34 = vmax.f32 %v918_v32, 0.0  ;;  %v920_v35 = vpop.f32.mrb[43].mxu0 }
 0x180   : > { %v1336_v37 = vmax.f32 %v920_v35, 0.0  ;;  %v3902_v35 = vld [vmem:[%s4247_s14 + $0x158] sm:$0xff]  }
 0x181   : > { %v1505_v38 = vpack.c.bf16 %v1335_v34, %v1333_v33  ;;  %1183 = vmatmul.mubr.bf16.gmra.mrb[148].mxu0 %v3896_v31  ;;  %v3903_v33 = vld [vmem:[%s4890_s2] ss:$24 sps:$4 sm:$0xff]  }
 0x182   : > { %v1506_v39 = vpack.c.bf16 %v1336_v37, %v1334_v36  ;;  %1192 = vmatprep.mubr.bf16.mxu0 %v4096_v0  ;;  %v3910_v36 = vld [vmem:[%s4890_s2 + $0x34] ss:$24 sps:$4 sm:$0x3f]  }
 0x184   : > { %v924_v40 = vpop.f32.mrb[44].mxu0  ;;  %1673 = vmatprep.subr.bf16.mxu1 %v1506_v39 }
 0x185   : > { %v926_v41 = vpop.f32.mrb[45].mxu0  ;;  %1674 = vmatpush1.bf16.msra.mxu1 %v1505_v38  ;;  %v1337_v44 = vmax.f32 %v924_v40, 0.0 }
 0x186   : > { %v928_v43 = vpop.f32.mrb[46].mxu0  ;;  %v1338_v47 = vmax.f32 %v926_v41, 0.0 }
 0x187   : > { %v1339_v45 = vmax.f32 %v928_v43, 0.0  ;;  %v930_v46 = vpop.f32.mrb[47].mxu0 }
 0x188   : > { %v1340_v48 = vmax.f32 %v930_v46, 0.0  ;;  %v3912_v46 = vld [vmem:[%s4890_s2 + $0x30] ss:$24 sps:$4 sm:$0x3f]  }
 0x189   : > { %v1507_v49 = vpack.c.bf16 %v1339_v45, %v1337_v44  ;;  %1193 = vmatmul.mubr.bf16.gmra.mrb[152].mxu0 %v3897_v42 }
 0x18a   : > { %v1508_v50 = vpack.c.bf16 %v1340_v48, %v1338_v47  ;;  %1202 = vmatprep.mubr.bf16.mxu0 %v4096_v0  ;;  %v3906_v48 = vld [vmem:[%s4247_s14 + $0x160] sm:$0xff]  }
 0x18c   : > { %v934_v51 = vpop.f32.mrb[48].mxu0  ;;  %1675 = vmatprep.subr.bf16.mxu1 %v1508_v50 }
 0x18d   : > { %v936_v52 = vpop.f32.mrb[49].mxu0  ;;  %1676 = vmatpush1.bf16.msra.mxu1 %v1507_v49  ;;  %v1341_v55 = vmax.f32 %v934_v51, 0.0  ;;  %v3915_v49 = vld [vmem:[%s4890_s2 + $0xc] ss:$24 sps:$4 sm:$0xff]  }
 0x18e   : > { %v938_v54 = vpop.f32.mrb[50].mxu0  ;;  %v1342_v58 = vmax.f32 %v936_v52, 0.0 }
 0x18f   : > { %v1343_v56 = vmax.f32 %v938_v54, 0.0  ;;  %v940_v57 = vpop.f32.mrb[51].mxu0 }
 0x190   : > { %v1344_v59 = vmax.f32 %v940_v57, 0.0 }
 0x191   : > { %v1509_v60 = vpack.c.bf16 %v1343_v56, %v1341_v55  ;;  %1203 = vmatmul.mubr.bf16.gmra.mrb[156].mxu0 %v3898_v53 }
 0x192   : > { %v1510_v61 = vpack.c.bf16 %v1344_v59, %v1342_v58  ;;  %1212 = vmatprep.mubr.bf16.mxu0 %v4096_v0 }
 0x194   : > { %v944_v62 = vpop.f32.mrb[52].mxu0  ;;  %1677 = vmatprep.subr.bf16.mxu1 %v1510_v61 }
 0x195   : > { %v946_v63 = vpop.f32.mrb[53].mxu0  ;;  %1678 = vmatpush1.bf16.msra.mxu1 %v1509_v60  ;;  %v1345_v3 = vmax.f32 %v944_v62, 0.0  ;;  %v3907_v60 = vld [vmem:[%s4247_s14 + $0x168] sm:$0xff]  }
 0x196   : > { %v948_v2 = vpop.f32.mrb[54].mxu0  ;;  %v1346_v6 = vmax.f32 %v946_v63, 0.0 }
 0x197   : > { %v1347_v4 = vmax.f32 %v948_v2, 0.0  ;;  %v950_v5 = vpop.f32.mrb[55].mxu0 }
 0x198   : > { %v1348_v7 = vmax.f32 %v950_v5, 0.0 }
 0x199   : > { %v1511_v8 = vpack.c.bf16 %v1347_v4, %v1345_v3  ;;  %1213 = vmatmul.mubr.bf16.gmra.mrb[160].mxu0 %v3899_v1 }
 0x19a   : > { %v1512_v9 = vpack.c.bf16 %v1348_v7, %v1346_v6  ;;  %1222 = vmatprep.mubr.bf16.mxu0 %v4096_v0 }
 0x19c   : > { %v954_v10 = vpop.f32.mrb[56].mxu0  ;;  %1679 = vmatprep.subr.bf16.mxu1 %v1512_v9 }
 0x19d   : > { %v956_v11 = vpop.f32.mrb[57].mxu0  ;;  %1680 = vmatpush1.bf16.msra.mxu1 %v1511_v8  ;;  %v1349_v14 = vmax.f32 %v954_v10, 0.0  ;;  %v3908_v8 = vld [vmem:[%s4247_s14 + $0x170] sm:$0xff]  }
 0x19e   : > { %v958_v13 = vpop.f32.mrb[58].mxu0  ;;  %v1350_v17 = vmax.f32 %v956_v11, 0.0 }
 0x19f   : > { %v1351_v15 = vmax.f32 %v958_v13, 0.0  ;;  %v960_v16 = vpop.f32.mrb[59].mxu0 }
 0x1a0   : > { %v1352_v18 = vmax.f32 %v960_v16, 0.0 }
 0x1a1   : > { %v1513_v19 = vpack.c.bf16 %v1351_v15, %v1349_v14  ;;  %1223 = vmatmul.mubr.bf16.gmra.mrb[164].mxu0 %v3900_v12 }
 0x1a2   : > { %v1514_v20 = vpack.c.bf16 %v1352_v18, %v1350_v17  ;;  %1232 = vmatprep.mubr.bf16.mxu0 %v4096_v0 }
 0x1a4   : > { %v964_v21 = vpop.f32.mrb[60].mxu0  ;;  %1681 = vmatprep.subr.bf16.mxu1 %v1514_v20 }
 0x1a5   : > { %v966_v22 = vpop.f32.mrb[61].mxu0  ;;  %1682 = vmatpush1.bf16.msra.mxu1 %v1513_v19  ;;  %v1353_v25 = vmax.f32 %v964_v21, 0.0  ;;  %v3909_v19 = vld [vmem:[%s4247_s14 + $0x178] sm:$0xff]   ;;  %s4102_s14 = smov 64  }
 0x1a6   : > { %v968_v24 = vpop.f32.mrb[62].mxu0  ;;  %v1354_v28 = vmax.f32 %v966_v22, 0.0 }
 0x1a7   : > { %v1355_v26 = vmax.f32 %v968_v24, 0.0  ;;  %v970_v27 = vpop.f32.mrb[63].mxu0 }
 0x1a8   : > { %v1356_v29 = vmax.f32 %v970_v27, 0.0 }
 0x1a9   : > { %v1515_v30 = vpack.c.bf16 %v1355_v26, %v1353_v25  ;;  %1233 = vmatmul.mubr.bf16.gmra.mrb[168].mxu0 %v3901_v23 }
 0x1aa   : > { %v1516_v31 = vpack.c.bf16 %v1356_v29, %v1354_v28  ;;  %1242 = vmatprep.mubr.bf16.mxu0 %v4096_v0 }
 0x1ac   : > { %v974_v32 = vpop.f32.mrb[64].mxu0  ;;  %1683 = vmatprep.subr.bf16.mxu1 %v1516_v31 }
 0x1ad   : > { %v976_v34 = vpop.f32.mrb[65].mxu0  ;;  %1684 = vmatpush1.bf16.msra.mxu1 %v1515_v30  ;;  %v1357_v38 = vmax.f32 %v974_v32, 0.0 }
 0x1ae   : > { %v978_v37 = vpop.f32.mrb[66].mxu0  ;;  %v1358_v41 = vmax.f32 %v976_v34, 0.0 }
 0x1af   : > { %v1359_v39 = vmax.f32 %v978_v37, 0.0  ;;  %v980_v40 = vpop.f32.mrb[67].mxu0 }
 0x1b0   : > { %v1360_v42 = vmax.f32 %v980_v40, 0.0  ;;  %1686 = vmatmul.mubr.bf16.vlgmr.msra.gmra.mrb[0].mxu1 %v3903_v33 }
 0x1b1   : > { %v1517_v43 = vpack.c.bf16 %v1359_v39, %v1357_v38  ;;  %1243 = vmatmul.mubr.bf16.gmra.mrb[172].mxu0 %v3902_v35  ;;  %1695 = vmatprep.mubr.bf16.mxu1 %v3910_v36 }
 0x1b2   : > { %v1518_v44 = vpack.c.bf16 %v1360_v42, %v1358_v41  ;;  %1252 = vmatprep.mubr.bf16.mxu0 %v4096_v0 }
 0x1b4   : > { %v984_v45 = vpop.f32.mrb[68].mxu0  ;;  %1704 = vmatprep.subr.bf16.mxu1 %v1518_v44 }
 0x1b5   : > { %v986_v47 = vpop.f32.mrb[69].mxu0  ;;  %1705 = vmatpush1.bf16.msra.mxu1 %v1517_v43  ;;  %v1361_v51 = vmax.f32 %v984_v45, 0.0 }
 0x1b6   : > { %v988_v50 = vpop.f32.mrb[70].mxu0  ;;  %v1362_v54 = vmax.f32 %v986_v47, 0.0 }
 0x1b7   : > { %v1363_v52 = vmax.f32 %v988_v50, 0.0  ;;  %v990_v53 = vpop.f32.mrb[71].mxu0 }
 0x1b8   : > { %v1364_v55 = vmax.f32 %v990_v53, 0.0  ;;  %1696 = vmatmul.mubr.bf16.gmra.mrb[4].mxu1 %v3912_v46 }
 0x1b9   : > { %v1519_v56 = vpack.c.bf16 %v1363_v52, %v1361_v51  ;;  %1253 = vmatmul.mubr.bf16.gmra.mrb[176].mxu0 %v3906_v48  ;;  %1736 = vmatprep.mubr.bf16.mxu1 %v3915_v49 }
 0x1ba   : > { %v1520_v57 = vpack.c.bf16 %v1364_v55, %v1362_v54  ;;  %1262 = vmatprep.mubr.bf16.mxu0 %v4096_v0 }
 0x1bc   : > { %v994_v58 = vpop.f32.mrb[72].mxu0  ;;  %1706 = vmatprep.subr.bf16.mxu1 %v1520_v57 }
 0x1bd   : > { %v996_v59 = vpop.f32.mrb[73].mxu0  ;;  %1707 = vmatpush1.bf16.msra.mxu1 %v1519_v56  ;;  %v1365_v62 = vmax.f32 %v994_v58, 0.0 }
 0x1be   : > { %v998_v61 = vpop.f32.mrb[74].mxu0  ;;  %v1366_v2 = vmax.f32 %v996_v59, 0.0 }
 0x1bf   : > { %v1367_v63 = vmax.f32 %v998_v61, 0.0  ;;  %v1000_v1 = vpop.f32.mrb[75].mxu0 }
 0x1c0   : > { %v1368_v3 = vmax.f32 %v1000_v1, 0.0 }
 0x1c1   : > { %v1521_v4 = vpack.c.bf16 %v1367_v63, %v1365_v62  ;;  %1263 = vmatmul.mubr.bf16.gmra.mrb[180].mxu0 %v3907_v60 }
 0x1c2   : > { %v1522_v5 = vpack.c.bf16 %v1368_v3, %v1366_v2  ;;  %1272 = vmatprep.mubr.bf16.mxu0 %v4096_v0 }
 0x1c4   : > { %v1004_v6 = vpop.f32.mrb[76].mxu0  ;;  %1708 = vmatprep.subr.bf16.mxu1 %v1522_v5 }
 0x1c5   : > { %v1006_v7 = vpop.f32.mrb[77].mxu0  ;;  %1709 = vmatpush1.bf16.msra.mxu1 %v1521_v4  ;;  %v1369_v10 = vmax.f32 %v1004_v6, 0.0 }
 0x1c6   : > { %v1008_v9 = vpop.f32.mrb[78].mxu0  ;;  %v1370_v13 = vmax.f32 %v1006_v7, 0.0 }
 0x1c7   : > { %v1371_v11 = vmax.f32 %v1008_v9, 0.0  ;;  %v1010_v12 = vpop.f32.mrb[79].mxu0 }
 0x1c8   : > { %v1372_v14 = vmax.f32 %v1010_v12, 0.0 }
 0x1c9   : > { %v1523_v15 = vpack.c.bf16 %v1371_v11, %v1369_v10  ;;  %1273 = vmatmul.mubr.bf16.gmra.mrb[184].mxu0 %v3908_v8 }
 0x1ca   : > { %v1524_v16 = vpack.c.bf16 %v1372_v14, %v1370_v13  ;;  %1282 = vmatprep.mubr.bf16.mxu0 %v4096_v0 }
 0x1cc   : > { %v1014_v17 = vpop.f32.mrb[80].mxu0  ;;  %1710 = vmatprep.subr.bf16.mxu1 %v1524_v16 }
 0x1cd   : > { %v1016_v18 = vpop.f32.mrb[81].mxu0  ;;  %1711 = vmatpush1.bf16.msra.mxu1 %v1523_v15  ;;  %v1373_v21 = vmax.f32 %v1014_v17, 0.0 }
 0x1ce   : > { %v1018_v20 = vpop.f32.mrb[82].mxu0  ;;  %v1374_v24 = vmax.f32 %v1016_v18, 0.0 }
 0x1cf   : > { %v1375_v22 = vmax.f32 %v1018_v20, 0.0  ;;  %v1020_v23 = vpop.f32.mrb[83].mxu0 }
 0x1d0   : > { %v1376_v25 = vmax.f32 %v1020_v23, 0.0 }
 0x1d1   : > { %v1525_v26 = vpack.c.bf16 %v1375_v22, %v1373_v21  ;;  %1283 = vmatmul.mubr.bf16.gmra.mrb[188].mxu0 %v3909_v19 }
 0x1d2   : > { %v1526_v27 = vpack.c.bf16 %v1376_v25, %v1374_v24 }
 0x1d4   : > { %v1024_v28 = vpop.f32.mrb[84].mxu0  ;;  %1712 = vmatprep.subr.bf16.mxu1 %v1526_v27 }
 0x1d5   : > { %v1026_v29 = vpop.f32.mrb[85].mxu0  ;;  %1713 = vmatpush1.bf16.msra.mxu1 %v1525_v26  ;;  %v1377_v0 = vmax.f32 %v1024_v28, 0.0 }
 0x1d6   : > { %v1028_v30 = vpop.f32.mrb[86].mxu0  ;;  %v1378_v33 = vmax.f32 %v1026_v29, 0.0 }
 0x1d7   : > { %v1379_v31 = vmax.f32 %v1028_v30, 0.0  ;;  %v1030_v32 = vpop.f32.mrb[87].mxu0 }
 0x1d8   : > { %v1380_v34 = vmax.f32 %v1030_v32, 0.0 }
 0x1d9   : > { %v1527_v35 = vpack.c.bf16 %v1379_v31, %v1377_v0 }
 0x1da   : > { %v1528_v36 = vpack.c.bf16 %v1380_v34, %v1378_v33 }
 0x1dc   : > { %v1034_v37 = vpop.f32.mrb[88].mxu0  ;;  %1714 = vmatprep.subr.bf16.mxu1 %v1528_v36 }
 0x1dd   : > { %v1036_v38 = vpop.f32.mrb[89].mxu0  ;;  %1715 = vmatpush1.bf16.msra.mxu1 %v1527_v35  ;;  %v1381_v40 = vmax.f32 %v1034_v37, 0.0 }
 0x1de   : > { %v1038_v39 = vpop.f32.mrb[90].mxu0  ;;  %v1382_v43 = vmax.f32 %v1036_v38, 0.0 }
 0x1df   : > { %v1383_v41 = vmax.f32 %v1038_v39, 0.0  ;;  %v1040_v42 = vpop.f32.mrb[91].mxu0 }
 0x1e0   : > { %v1384_v44 = vmax.f32 %v1040_v42, 0.0 }
 0x1e1   : > { %v1529_v45 = vpack.c.bf16 %v1383_v41, %v1381_v40 }
 0x1e2   : > { %v1530_v46 = vpack.c.bf16 %v1384_v44, %v1382_v43 }
 0x1e4   : > { %v1044_v47 = vpop.f32.mrb[92].mxu0  ;;  %1716 = vmatprep.subr.bf16.mxu1 %v1530_v46 }
 0x1e5   : > { %v1046_v48 = vpop.f32.mrb[93].mxu0  ;;  %1717 = vmatpush1.bf16.msra.mxu1 %v1529_v45  ;;  %v1385_v50 = vmax.f32 %v1044_v47, 0.0 }
 0x1e6   : > { %v1048_v49 = vpop.f32.mrb[94].mxu0  ;;  %v1386_v53 = vmax.f32 %v1046_v48, 0.0 }
 0x1e7   : > { %v1387_v51 = vmax.f32 %v1048_v49, 0.0  ;;  %v1050_v52 = vpop.f32.mrb[95].mxu0 }
 0x1e8   : > { %v1388_v54 = vmax.f32 %v1050_v52, 0.0 }
 0x1e9   : > { %v1531_v55 = vpack.c.bf16 %v1387_v51, %v1385_v50 }
 0x1ea   : > { %v1532_v56 = vpack.c.bf16 %v1388_v54, %v1386_v53 }
 0x1ec   : > { %v1054_v57 = vpop.f32.mrb[96].mxu0  ;;  %1718 = vmatprep.subr.bf16.mxu1 %v1532_v56 }
 0x1ed   : > { %v1056_v58 = vpop.f32.mrb[97].mxu0  ;;  %1719 = vmatpush1.bf16.msra.mxu1 %v1531_v55  ;;  %v1389_v60 = vmax.f32 %v1054_v57, 0.0 }
 0x1ee   : > { %v1058_v59 = vpop.f32.mrb[98].mxu0  ;;  %v1390_v63 = vmax.f32 %v1056_v58, 0.0 }
 0x1ef   : > { %v1391_v61 = vmax.f32 %v1058_v59, 0.0  ;;  %v1060_v62 = vpop.f32.mrb[99].mxu0 }
 0x1f0   : > { %v1392_v1 = vmax.f32 %v1060_v62, 0.0 }
 0x1f1   : > { %v1533_v2 = vpack.c.bf16 %v1391_v61, %v1389_v60 }
 0x1f2   : > { %v1534_v3 = vpack.c.bf16 %v1392_v1, %v1390_v63 }
 0x1f4   : > { %v1064_v4 = vpop.f32.mrb[100].mxu0  ;;  %1720 = vmatprep.subr.bf16.mxu1 %v1534_v3 }
 0x1f5   : > { %v1066_v5 = vpop.f32.mrb[101].mxu0  ;;  %1721 = vmatpush1.bf16.msra.mxu1 %v1533_v2  ;;  %v1393_v7 = vmax.f32 %v1064_v4, 0.0 }
 0x1f6   : > { %v1068_v6 = vpop.f32.mrb[102].mxu0  ;;  %v1394_v10 = vmax.f32 %v1066_v5, 0.0 }
 0x1f7   : > { %v1395_v8 = vmax.f32 %v1068_v6, 0.0  ;;  %v1070_v9 = vpop.f32.mrb[103].mxu0 }
 0x1f8   : > { %v1396_v11 = vmax.f32 %v1070_v9, 0.0 }
 0x1f9   : > { %v1535_v12 = vpack.c.bf16 %v1395_v8, %v1393_v7 }
 0x1fa   : > { %v1536_v13 = vpack.c.bf16 %v1396_v11, %v1394_v10  ;;  %v3913_v11 = vld [vmem:[%s4890_s2 + $0x8] ss:$24 sps:$4 sm:$0xff]  }
 0x1fc   : > { %v1074_v14 = vpop.f32.mrb[104].mxu0  ;;  %1722 = vmatprep.subr.bf16.mxu1 %v1536_v13  ;;  %v3916_v13 = vld [vmem:[%s4890_s2 + $0x3c] ss:$24 sps:$4 sm:$0x3f]  }
 0x1fd   : > { %v1076_v15 = vpop.f32.mrb[105].mxu0  ;;  %1723 = vmatpush1.bf16.msra.mxu1 %v1535_v12  ;;  %v1397_v17 = vmax.f32 %v1074_v14, 0.0 }
 0x1fe   : > { %v1078_v16 = vpop.f32.mrb[106].mxu0  ;;  %v1398_v20 = vmax.f32 %v1076_v15, 0.0 }
 0x1ff   : > { %v1399_v18 = vmax.f32 %v1078_v16, 0.0  ;;  %v1080_v19 = vpop.f32.mrb[107].mxu0 }
 0x200   : > { %v1400_v21 = vmax.f32 %v1080_v19, 0.0 }
 0x201   : > { %v1537_v22 = vpack.c.bf16 %v1399_v18, %v1397_v17 }
 0x202   : > { %v1538_v23 = vpack.c.bf16 %v1400_v21, %v1398_v20 }
 0x204   : > { %v1084_v24 = vpop.f32.mrb[108].mxu0  ;;  %1724 = vmatprep.subr.bf16.mxu1 %v1538_v23  ;;  %v3918_v23 = vld [vmem:[%s4890_s2 + $0x38] ss:$24 sps:$4 sm:$0x3f]  }
 0x205   : > { %v1086_v25 = vpop.f32.mrb[109].mxu0  ;;  %1725 = vmatpush1.bf16.msra.mxu1 %v1537_v22  ;;  %v1401_v27 = vmax.f32 %v1084_v24, 0.0 }
 0x206   : > { %v1088_v26 = vpop.f32.mrb[110].mxu0  ;;  %v1402_v30 = vmax.f32 %v1086_v25, 0.0  ;;  %v3921_v25 = vld [vmem:[%s4890_s2 + $0x14] ss:$24 sps:$4 sm:$0xff]  }
 0x207   : > { %v1403_v28 = vmax.f32 %v1088_v26, 0.0  ;;  %v1090_v29 = vpop.f32.mrb[111].mxu0 }
 0x208   : > { %v1404_v0 = vmax.f32 %v1090_v29, 0.0 }
 0x209   : > { %v1539_v31 = vpack.c.bf16 %v1403_v28, %v1401_v27 }
 0x20a   : > { %v1540_v32 = vpack.c.bf16 %v1404_v0, %v1402_v30 }
 0x20c   : > { %v1094_v33 = vpop.f32.mrb[112].mxu0  ;;  %1726 = vmatprep.subr.bf16.mxu1 %v1540_v32  ;;  %v4097_v32 = vmov 0.0  }
 0x20d   : > { %v1096_v34 = vpop.f32.mrb[113].mxu0  ;;  %1727 = vmatpush1.bf16.msra.mxu1 %v1539_v31  ;;  %v1405_v36 = vmax.f32 %v1094_v33, 0.0  ;;  %3701 = vmatprep.subr.bf16.mxu0 %v4097_v32 }
 0x20e   : > { %v1098_v35 = vpop.f32.mrb[114].mxu0  ;;  %v1406_v39 = vmax.f32 %v1096_v34, 0.0  ;;  %v3928_v34 = vld [vmem:[%s4891_s3 + $0x140] sm:$0xff]   ;;  %3717 = vmatprep.mubr.msk.bf16.mxu0 %vm4098_vm0, %v4097_v32 }
 0x20f   : > { %v1407_v37 = vmax.f32 %v1098_v35, 0.0  ;;  %v1100_v38 = vpop.f32.mrb[115].mxu0  ;;  %3702 = vmatpush3.bf16.msra.mxu0 %v3928_v34 }
 0x210   : > { %v1408_v40 = vmax.f32 %v1100_v38, 0.0  ;;  %3703 = vmatprep.subr.bf16.mxu0 %v4097_v32  ;;  %v3930_v38 = vld [vmem:[%s4891_s3 + $0x148] sm:$0xff]  }
 0x211   : > { %v1541_v41 = vpack.c.bf16 %v1407_v37, %v1405_v36 }
 0x212   : > { %v1542_v42 = vpack.c.bf16 %v1408_v40, %v1406_v39 }
 0x213   : > { %3704 = vmatpush3.bf16.msra.mxu0 %v3930_v38 }
 0x214   : > { %v1104_v43 = vpop.f32.mrb[116].mxu0  ;;  %1728 = vmatprep.subr.bf16.mxu1 %v1542_v42  ;;  %3705 = vmatprep.subr.bf16.mxu0 %v4097_v32 }
 0x215   : > { %v1106_v44 = vpop.f32.mrb[117].mxu0  ;;  %1729 = vmatpush1.bf16.msra.mxu1 %v1541_v41  ;;  %v1409_v46 = vmax.f32 %v1104_v43, 0.0 }
 0x216   : > { %v1108_v45 = vpop.f32.mrb[118].mxu0  ;;  %v1410_v49 = vmax.f32 %v1106_v44, 0.0 }
 0x217   : > { %v1411_v47 = vmax.f32 %v1108_v45, 0.0  ;;  %v1110_v48 = vpop.f32.mrb[119].mxu0 }
 0x218   : > { %v1412_v50 = vmax.f32 %v1110_v48, 0.0 }
 0x219   : > { %v1543_v51 = vpack.c.bf16 %v1411_v47, %v1409_v46  ;;  %v3932_v46 = vld [vmem:[%s4891_s3 + $0x150] sm:$0xff]  }
 0x21a   : > { %v1544_v52 = vpack.c.bf16 %v1412_v50, %v1410_v49  ;;  %3706 = vmatpush3.bf16.msra.mxu0 %v3932_v46  ;;  %v3934_v50 = vld [vmem:[%s4891_s3 + $0x158] sm:$0xff]  }
 0x21b   : > { %3707 = vmatprep.subr.bf16.mxu0 %v4097_v32 }
 0x21c   : > { %v1114_v53 = vpop.f32.mrb[120].mxu0  ;;  %1730 = vmatprep.subr.bf16.mxu1 %v1544_v52 }
 0x21d   : > { %v1116_v54 = vpop.f32.mrb[121].mxu0  ;;  %1731 = vmatpush1.bf16.msra.mxu1 %v1543_v51  ;;  %v1413_v56 = vmax.f32 %v1114_v53, 0.0 }
 0x21e   : > { %v1118_v55 = vpop.f32.mrb[122].mxu0  ;;  %v1414_v59 = vmax.f32 %v1116_v54, 0.0  ;;  %3708 = vmatpush3.bf16.msra.mxu0 %v3934_v50 }
 0x21f   : > { %v1415_v57 = vmax.f32 %v1118_v55, 0.0  ;;  %v1120_v58 = vpop.f32.mrb[123].mxu0  ;;  %3709 = vmatprep.subr.bf16.mxu0 %v4097_v32 }
 0x220   : > { %v1416_v60 = vmax.f32 %v1120_v58, 0.0 }
 0x221   : > { %v1545_v61 = vpack.c.bf16 %v1415_v57, %v1413_v56 }
 0x222   : > { %v1546_v62 = vpack.c.bf16 %v1416_v60, %v1414_v59 }
 0x224   : > { %v1124_v63 = vpop.f32.mrb[124].mxu0  ;;  %1732 = vmatprep.subr.bf16.mxu1 %v1546_v62 }
 0x225   : > { %v1126_v1 = vpop.f32.mrb[125].mxu0  ;;  %1733 = vmatpush1.bf16.msra.mxu1 %v1545_v61  ;;  %v1417_v3 = vmax.f32 %v1124_v63, 0.0 }
 0x226   : > { %v1128_v2 = vpop.f32.mrb[126].mxu0  ;;  %v1418_v6 = vmax.f32 %v1126_v1, 0.0 }
 0x227   : > { %v1419_v4 = vmax.f32 %v1128_v2, 0.0  ;;  %v1130_v5 = vpop.f32.mrb[127].mxu0 }
 0x228   : > { %v1420_v7 = vmax.f32 %v1130_v5, 0.0 }
 0x229   : > { %v1547_v8 = vpack.c.bf16 %v1419_v4, %v1417_v3 }
 0x22a   : > { %v1548_v9 = vpack.c.bf16 %v1420_v7, %v1418_v6 }
 0x22c   : > { %v1134_v10 = vpop.f32.mrb[128].mxu0  ;;  %1734 = vmatprep.subr.bf16.mxu1 %v1548_v9 }
 0x22d   : > { %v1136_v12 = vpop.f32.mrb[129].mxu0  ;;  %1735 = vmatpush1.bf16.msra.mxu1 %v1547_v8  ;;  %v1421_v15 = vmax.f32 %v1134_v10, 0.0 }
 0x22e   : > { %v1138_v14 = vpop.f32.mrb[130].mxu0  ;;  %v1422_v18 = vmax.f32 %v1136_v12, 0.0 }
 0x22f   : > { %v1423_v16 = vmax.f32 %v1138_v14, 0.0  ;;  %v1140_v17 = vpop.f32.mrb[131].mxu0 }
 0x230   : > { %v1424_v19 = vmax.f32 %v1140_v17, 0.0  ;;  %1737 = vmatmul.mubr.bf16.vlgmr.msra.gmra.mrb[0].mxu1 %v3913_v11 }
 0x231   : > { %v1549_v20 = vpack.c.bf16 %v1423_v16, %v1421_v15  ;;  %1746 = vmatprep.mubr.bf16.mxu1 %v3916_v13 }
 0x232   : > { %v1550_v21 = vpack.c.bf16 %v1424_v19, %v1422_v18 }
 0x234   : > { %v1144_v22 = vpop.f32.mrb[132].mxu0  ;;  %1755 = vmatprep.subr.bf16.mxu1 %v1550_v21 }
 0x235   : > { %v1146_v24 = vpop.f32.mrb[133].mxu0  ;;  %1756 = vmatpush1.bf16.msra.mxu1 %v1549_v20  ;;  %v1425_v27 = vmax.f32 %v1144_v22, 0.0 }
 0x236   : > { %v1148_v26 = vpop.f32.mrb[134].mxu0  ;;  %v1426_v30 = vmax.f32 %v1146_v24, 0.0 }
 0x237   : > { %v1427_v28 = vmax.f32 %v1148_v26, 0.0  ;;  %v1150_v29 = vpop.f32.mrb[135].mxu0 }
 0x238   : > { %v1428_v0 = vmax.f32 %v1150_v29, 0.0  ;;  %1747 = vmatmul.mubr.bf16.gmra.mrb[4].mxu1 %v3918_v23 }
 0x239   : > { %v1551_v31 = vpack.c.bf16 %v1427_v28, %v1425_v27  ;;  %1787 = vmatprep.mubr.bf16.mxu1 %v3921_v25 }
 0x23a   : > { %v1552_v33 = vpack.c.bf16 %v1428_v0, %v1426_v30 }
 0x23c   : > { %v1154_v35 = vpop.f32.mrb[136].mxu0  ;;  %1757 = vmatprep.subr.bf16.mxu1 %v1552_v33 }
 0x23d   : > { %v1156_v36 = vpop.f32.mrb[137].mxu0  ;;  %1758 = vmatpush1.bf16.msra.mxu1 %v1551_v31  ;;  %v1429_v39 = vmax.f32 %v1154_v35, 0.0 }
 0x23e   : > { %v1158_v37 = vpop.f32.mrb[138].mxu0  ;;  %v1430_v42 = vmax.f32 %v1156_v36, 0.0 }
 0x23f   : > { %v1431_v40 = vmax.f32 %v1158_v37, 0.0  ;;  %v1160_v41 = vpop.f32.mrb[139].mxu0 }
 0x240   : > { %v1432_v43 = vmax.f32 %v1160_v41, 0.0 }
 0x241   : > { %v1553_v44 = vpack.c.bf16 %v1431_v40, %v1429_v39 }
 0x242   : > { %v1554_v45 = vpack.c.bf16 %v1432_v43, %v1430_v42 }
 0x244   : > { %v1164_v47 = vpop.f32.mrb[140].mxu0  ;;  %1759 = vmatprep.subr.bf16.mxu1 %v1554_v45 }
 0x245   : > { %v1166_v48 = vpop.f32.mrb[141].mxu0  ;;  %1760 = vmatpush1.bf16.msra.mxu1 %v1553_v44  ;;  %v1433_v51 = vmax.f32 %v1164_v47, 0.0 }
 0x246   : > { %v1168_v49 = vpop.f32.mrb[142].mxu0  ;;  %v1434_v54 = vmax.f32 %v1166_v48, 0.0 }
 0x247   : > { %v1435_v52 = vmax.f32 %v1168_v49, 0.0  ;;  %v1170_v53 = vpop.f32.mrb[143].mxu0 }
 0x248   : > { %v1436_v55 = vmax.f32 %v1170_v53, 0.0 }
 0x249   : > { %v1555_v56 = vpack.c.bf16 %v1435_v52, %v1433_v51 }
 0x24a   : > { %v1556_v57 = vpack.c.bf16 %v1436_v55, %v1434_v54 }
 0x24c   : > { %v1174_v58 = vpop.f32.mrb[144].mxu0  ;;  %1761 = vmatprep.subr.bf16.mxu1 %v1556_v57 }
 0x24d   : > { %v1176_v59 = vpop.f32.mrb[145].mxu0  ;;  %1762 = vmatpush1.bf16.msra.mxu1 %v1555_v56  ;;  %v1437_v61 = vmax.f32 %v1174_v58, 0.0 }
 0x24e   : > { %v1178_v60 = vpop.f32.mrb[146].mxu0  ;;  %v1438_v1 = vmax.f32 %v1176_v59, 0.0 }
 0x24f   : > { %v1439_v62 = vmax.f32 %v1178_v60, 0.0  ;;  %v1180_v63 = vpop.f32.mrb[147].mxu0 }
 0x250   : > { %v1440_v2 = vmax.f32 %v1180_v63, 0.0 }
 0x251   : > { %v1557_v3 = vpack.c.bf16 %v1439_v62, %v1437_v61 }
 0x252   : > { %v1558_v4 = vpack.c.bf16 %v1440_v2, %v1438_v1 }
 0x254   : > { %v1184_v5 = vpop.f32.mrb[148].mxu0  ;;  %1763 = vmatprep.subr.bf16.mxu1 %v1558_v4 }
 0x255   : > { %v1186_v6 = vpop.f32.mrb[149].mxu0  ;;  %1764 = vmatpush1.bf16.msra.mxu1 %v1557_v3  ;;  %v1441_v8 = vmax.f32 %v1184_v5, 0.0 }
 0x256   : > { %v1188_v7 = vpop.f32.mrb[150].mxu0  ;;  %v1442_v11 = vmax.f32 %v1186_v6, 0.0 }
 0x257   : > { %v1443_v9 = vmax.f32 %v1188_v7, 0.0  ;;  %v1190_v10 = vpop.f32.mrb[151].mxu0 }
 0x258   : > { %v1444_v12 = vmax.f32 %v1190_v10, 0.0 }
 0x259   : > { %v1559_v13 = vpack.c.bf16 %v1443_v9, %v1441_v8 }
 0x25a   : > { %v1560_v14 = vpack.c.bf16 %v1444_v12, %v1442_v11 }
 0x25c   : > { %v1194_v15 = vpop.f32.mrb[152].mxu0  ;;  %1765 = vmatprep.subr.bf16.mxu1 %v1560_v14 }
 0x25d   : > { %v1196_v16 = vpop.f32.mrb[153].mxu0  ;;  %1766 = vmatpush1.bf16.msra.mxu1 %v1559_v13  ;;  %v1445_v18 = vmax.f32 %v1194_v15, 0.0 }
 0x25e   : > { %v1198_v17 = vpop.f32.mrb[154].mxu0  ;;  %v1446_v21 = vmax.f32 %v1196_v16, 0.0 }
 0x25f   : > { %v1447_v19 = vmax.f32 %v1198_v17, 0.0  ;;  %v1200_v20 = vpop.f32.mrb[155].mxu0 }
 0x260   : > { %v1448_v22 = vmax.f32 %v1200_v20, 0.0 }
 0x261   : > { %v1561_v23 = vpack.c.bf16 %v1447_v19, %v1445_v18 }
 0x262   : > { %v1562_v24 = vpack.c.bf16 %v1448_v22, %v1446_v21 }
 0x264   : > { %v1204_v25 = vpop.f32.mrb[156].mxu0  ;;  %1767 = vmatprep.subr.bf16.mxu1 %v1562_v24 }
 0x265   : > { %v1206_v26 = vpop.f32.mrb[157].mxu0  ;;  %1768 = vmatpush1.bf16.msra.mxu1 %v1561_v23  ;;  %v1449_v28 = vmax.f32 %v1204_v25, 0.0 }
 0x266   : > { %v1208_v27 = vpop.f32.mrb[158].mxu0  ;;  %v1450_v0 = vmax.f32 %v1206_v26, 0.0 }
 0x267   : > { %v1451_v29 = vmax.f32 %v1208_v27, 0.0  ;;  %v1210_v30 = vpop.f32.mrb[159].mxu0 }
 0x268   : > { %v1452_v31 = vmax.f32 %v1210_v30, 0.0 }
 0x269   : > { %v1563_v33 = vpack.c.bf16 %v1451_v29, %v1449_v28 }
 0x26a   : > { %v1564_v34 = vpack.c.bf16 %v1452_v31, %v1450_v0 }
 0x26c   : > { %v1214_v35 = vpop.f32.mrb[160].mxu0  ;;  %1769 = vmatprep.subr.bf16.mxu1 %v1564_v34 }
 0x26d   : > { %v1216_v36 = vpop.f32.mrb[161].mxu0  ;;  %1770 = vmatpush1.bf16.msra.mxu1 %v1563_v33  ;;  %v1453_v38 = vmax.f32 %v1214_v35, 0.0 }
 0x26e   : > { %v1218_v37 = vpop.f32.mrb[162].mxu0  ;;  %v1454_v41 = vmax.f32 %v1216_v36, 0.0 }
 0x26f   : > { %v1455_v39 = vmax.f32 %v1218_v37, 0.0  ;;  %v1220_v40 = vpop.f32.mrb[163].mxu0 }
 0x270   : > { %v1456_v42 = vmax.f32 %v1220_v40, 0.0 }
 0x271   : > { %v1565_v43 = vpack.c.bf16 %v1455_v39, %v1453_v38 }
 0x272   : > { %v1566_v44 = vpack.c.bf16 %v1456_v42, %v1454_v41 }
 0x274   : > { %v1224_v45 = vpop.f32.mrb[164].mxu0  ;;  %1771 = vmatprep.subr.bf16.mxu1 %v1566_v44 }
 0x275   : > { %v1226_v46 = vpop.f32.mrb[165].mxu0  ;;  %1772 = vmatpush1.bf16.msra.mxu1 %v1565_v43  ;;  %v1457_v48 = vmax.f32 %v1224_v45, 0.0 }
 0x276   : > { %v1228_v47 = vpop.f32.mrb[166].mxu0  ;;  %v1458_v51 = vmax.f32 %v1226_v46, 0.0 }
 0x277   : > { %v1459_v49 = vmax.f32 %v1228_v47, 0.0  ;;  %v1230_v50 = vpop.f32.mrb[167].mxu0 }
 0x278   : > { %v1460_v52 = vmax.f32 %v1230_v50, 0.0 }
 0x279   : > { %v1567_v53 = vpack.c.bf16 %v1459_v49, %v1457_v48 }
 0x27a   : > { %v1568_v54 = vpack.c.bf16 %v1460_v52, %v1458_v51  ;;  %v3919_v52 = vld [vmem:[%s4890_s2 + $0x10] ss:$24 sps:$4 sm:$0xff]  }
 0x27c   : > { %v1234_v55 = vpop.f32.mrb[168].mxu0  ;;  %1773 = vmatprep.subr.bf16.mxu1 %v1568_v54  ;;  %v3925_v54 = vld [vmem:[%s4891_s3] sm:$0xff]  }
 0x27d   : > { %v1236_v56 = vpop.f32.mrb[169].mxu0  ;;  %1774 = vmatpush1.bf16.msra.mxu1 %v1567_v53  ;;  %v1461_v58 = vmax.f32 %v1234_v55, 0.0  ;;  %v3922_v53 = vld [vmem:[%s4890_s2 + $0x44] ss:$24 sps:$4 sm:$0x3f]   ;;  %v3926_v55 = vld [vmem:[%s4891_s3 + $0x8] sm:$0xff]  }
 0x27e   : > { %v1238_v57 = vpop.f32.mrb[170].mxu0  ;;  %v1462_v61 = vmax.f32 %v1236_v56, 0.0  ;;  %v3924_v56 = vld [vmem:[%s4890_s2 + $0x40] ss:$24 sps:$4 sm:$0x3f]  }
 0x27f   : > { %v1463_v59 = vmax.f32 %v1238_v57, 0.0  ;;  %v1240_v60 = vpop.f32.mrb[171].mxu0  ;;  %v3927_v57 = vld [vmem:[%s4891_s3 + $0x10] sm:$0xff]  }
 0x280   : > { %v1464_v62 = vmax.f32 %v1240_v60, 0.0  ;;  %v3933_v60 = vld [vmem:[%s4891_s3 + $0x28] sm:$0xff]  }
 0x281   : > { %v1569_v63 = vpack.c.bf16 %v1463_v59, %v1461_v58  ;;  %v3929_v58 = vld [vmem:[%s4891_s3 + $0x18] sm:$0xff]   ;;  %v3931_v59 = vld [vmem:[%s4891_s3 + $0x20] sm:$0xff]  }
 0x282   : > { %v1570_v1 = vpack.c.bf16 %v1464_v62, %v1462_v61  ;;  %v3935_v61 = vld [vmem:[%s4891_s3 + $0x30] sm:$0xff]   ;;  %v3936_v62 = vld [vmem:[%s4891_s3 + $0x160] sm:$0xff]  }
 0x283   : > { %3710 = vmatpush3.bf16.msra.mxu0 %v3936_v62 }
 0x284   : > { %v1244_v2 = vpop.f32.mrb[172].mxu0  ;;  %1775 = vmatprep.subr.bf16.mxu1 %v1570_v1  ;;  %3711 = vmatprep.subr.bf16.mxu0 %v4097_v32  ;;  %v3938_v1 = vld [vmem:[%s4891_s3 + $0x168] sm:$0xff]  }
 0x285   : > { %v1246_v3 = vpop.f32.mrb[173].mxu0  ;;  %1776 = vmatpush1.bf16.msra.mxu1 %v1569_v63  ;;  %v1465_v5 = vmax.f32 %v1244_v2, 0.0  ;;  %v3937_v63 = vld [vmem:[%s4891_s3 + $0x38] sm:$0xff]   ;;  %v3939_v2 = vld [vmem:[%s4891_s3 + $0x170] sm:$0xff]  }
 0x286   : > { %v1248_v4 = vpop.f32.mrb[174].mxu0  ;;  %v1466_v8 = vmax.f32 %v1246_v3, 0.0  ;;  %v3940_v3 = vld [vmem:[%s4891_s3 + $0x178] sm:$0xff]  }
 0x287   : > { %v1467_v6 = vmax.f32 %v1248_v4, 0.0  ;;  %v1250_v7 = vpop.f32.mrb[175].mxu0  ;;  %3712 = vmatpush3.bf16.msra.mxu0 %v3938_v1  ;;  %v3955_v1 = vld [vmem:[%s4891_s3 + $0x90] sm:$0xff]  }
 0x288   : > { %v1468_v9 = vmax.f32 %v1250_v7, 0.0  ;;  %3713 = vmatprep.subr.bf16.mxu0 %v4097_v32  ;;  %v3941_v7 = vld [vmem:[%s4893_s5] sm:$0xff]  }
 0x289   : > { %v1571_v10 = vpack.c.bf16 %v1467_v6, %v1465_v5 }
 0x28a   : > { %v1572_v11 = vpack.c.bf16 %v1468_v9, %v1466_v8 }
 0x28b   : > { %3714 = vmatpush3.bf16.msra.mxu0 %v3939_v2  ;;  %v3956_v2 = vld [vmem:[%s4891_s3 + $0x98] sm:$0xff]  }
 0x28c   : > { %v1254_v12 = vpop.f32.mrb[176].mxu0  ;;  %1777 = vmatprep.subr.bf16.mxu1 %v1572_v11  ;;  %3715 = vmatprep.subr.bf16.mxu0 %v4097_v32 }
 0x28d   : > { %v1256_v13 = vpop.f32.mrb[177].mxu0  ;;  %1778 = vmatpush1.bf16.msra.mxu1 %v1571_v10  ;;  %v1469_v15 = vmax.f32 %v1254_v12, 0.0 }
 0x28e   : > { %v1258_v14 = vpop.f32.mrb[178].mxu0  ;;  %v1470_v18 = vmax.f32 %v1256_v13, 0.0 }
 0x28f   : > { %v1471_v16 = vmax.f32 %v1258_v14, 0.0  ;;  %v1260_v17 = vpop.f32.mrb[179].mxu0  ;;  %3716 = vmatpush3.bf16.msra.mxu0 %v3940_v3  ;;  %v3957_v3 = vld [vmem:[%s4891_s3 + $0xa0] sm:$0xff]  }
 0x290   : > { %v1472_v19 = vmax.f32 %v1260_v17, 0.0  ;;  %3749 = vmatprep.subr.bf16.mxu0 %v4097_v32  ;;  %v3942_v17 = vld [vmem:[%s4893_s5 + $0x8] sm:$0xff]  }
 0x291   : > { %v1573_v20 = vpack.c.bf16 %v1471_v16, %v1469_v15 }
 0x292   : > { %v1574_v21 = vpack.c.bf16 %v1472_v19, %v1470_v18  ;;  %v1827_v18 = vlaneseq }
 0x294   : > { %v1264_v22 = vpop.f32.mrb[180].mxu0  ;;  %1779 = vmatprep.subr.bf16.mxu1 %v1574_v21  ;;  %v4527_v19 = vshrl.u32 %v1827_v18, 7  ;;  %v4533_v21 = vld [vmem:[%s4892_s4] sm:$0x7f] }
 0x295   : > { %v1266_v23 = vpop.f32.mrb[181].mxu0  ;;  %1780 = vmatpush1.bf16.msra.mxu1 %v1573_v20  ;;  %v1473_v25 = vmax.f32 %v1264_v22, 0.0 }
 0x296   : > { %v1268_v24 = vpop.f32.mrb[182].mxu0  ;;  %v1474_v28 = vmax.f32 %v1266_v23, 0.0  ;;  %v1829_v20 = vsub.s32 0, %v4527_v19 }
 0x297   : > { %v1475_v26 = vmax.f32 %v1268_v24, 0.0  ;;  %v1270_v27 = vpop.f32.mrb[183].mxu0 }
 0x298   : > { %v1476_v29 = vmax.f32 %v1270_v27, 0.0  ;;  %v1830_v22 = vrot.slane %v4533_v21, %v1829_v20  ;;  %v3943_v27 = vld [vmem:[%s4891_s3 + $0x40] sm:$0xff]  }
 0x299   : > { %v1575_v30 = vpack.c.bf16 %v1475_v26, %v1473_v25 }
 0x29a   : > { %v1576_v0 = vpack.c.bf16 %v1476_v29, %v1474_v28 }
 0x29c   : > { %v1274_v31 = vpop.f32.mrb[184].mxu0  ;;  %1781 = vmatprep.subr.bf16.mxu1 %v1576_v0  ;;  %v3944_v0 = vld [vmem:[%s4891_s3 + $0x48] sm:$0xff]  }
 0x29d   : > { %v1276_v33 = vpop.f32.mrb[185].mxu0  ;;  %1782 = vmatpush1.bf16.msra.mxu1 %v1575_v30  ;;  %v1477_v35 = vmax.f32 %v1274_v31, 0.0  ;;  %v2707_v30 = vsub.s32 5, %v4527_v19 }
 0x29e   : > { %v1278_v34 = vpop.f32.mrb[186].mxu0  ;;  %v1478_v38 = vmax.f32 %v1276_v33, 0.0  ;;  %v3945_v33 = vld [vmem:[%s4891_s3 + $0x50] sm:$0xff]  }
 0x29f   : > { %v1479_v36 = vmax.f32 %v1278_v34, 0.0  ;;  %v1280_v37 = vpop.f32.mrb[187].mxu0  ;;  %v2708_v31 = vrot.slane %v4533_v21, %v2707_v30 }
 0x2a0   : > { %v1480_v39 = vmax.f32 %v1280_v37, 0.0 }
 0x2a1   : > { %v1577_v40 = vpack.c.bf16 %v1479_v36, %v1477_v35 }
 0x2a2   : > { %v1578_v41 = vpack.c.bf16 %v1480_v39, %v1478_v38  ;;  %v3946_v39 = vld [vmem:[%s4891_s3 + $0x58] sm:$0xff]  }
 0x2a4   : > { %v1284_v42 = vpop.f32.mrb[188].mxu0  ;;  %1783 = vmatprep.subr.bf16.mxu1 %v1578_v41  ;;  %v3948_v41 = vld [vmem:[%s4891_s3 + $0x68] sm:$0xff]  }
 0x2a5   : > { %v1286_v43 = vpop.f32.mrb[189].mxu0  ;;  %1784 = vmatpush1.bf16.msra.mxu1 %v1577_v40  ;;  %v1481_v45 = vmax.f32 %v1284_v42, 0.0  ;;  %v3947_v40 = vld [vmem:[%s4891_s3 + $0x60] sm:$0xff]   ;;  %v3949_v42 = vld [vmem:[%s4891_s3 + $0x70] sm:$0xff]  }
 0x2a6   : > { %v1288_v44 = vpop.f32.mrb[190].mxu0  ;;  %v1482_v48 = vmax.f32 %v1286_v43, 0.0  ;;  %v3950_v43 = vld [vmem:[%s4891_s3 + $0x78] sm:$0xff]  }
 0x2a7   : > { %v1483_v46 = vmax.f32 %v1288_v44, 0.0  ;;  %v1290_v47 = vpop.f32.mrb[191].mxu0 }
 0x2a8   : > { %v1484_v49 = vmax.f32 %v1290_v47, 0.0  ;;  %v4597_v47 = vld [vmem:[%s4894_s6] sm:$0x7f] }
 0x2a9   : > { %v1579_v50 = vpack.c.bf16 %v1483_v46, %v1481_v45  ;;  %v3951_v45 = vld [vmem:[%s4893_s5 + $0x10] sm:$0xff]   ;;  %v3952_v46 = vld [vmem:[%s4893_s5 + $0x18] sm:$0xff]  }
 0x2aa   : > { %v1580_v51 = vpack.c.bf16 %v1484_v49, %v1482_v48  ;;  %v1927_v48 = vrot.slane %v4597_v47, %v1829_v20 }
 0x2ac   : > { %1785 = vmatprep.subr.bf16.mxu1 %v1580_v51 }
 0x2ad   : > { %1786 = vmatpush1.bf16.msra.mxu1 %v1579_v50 }
 0x2ae   : > { %3561 = vmatprep.subr.bf16.mxu1 %v4097_v32 }
 0x2b0   : > { %1788 = vmatmul.mubr.bf16.vlgmr.msra.gmra.mrb[0].mxu1 %v3919_v52 }
 0x2b1   : > { %1797 = vmatprep.mubr.bf16.mxu1 %v3922_v53  ;;  %3562 = vmatpush3.bf16.msra.mxu1 %v3925_v54  ;;  %v2003_v54 = vsub.s32 1, %v4527_v19 }
 0x2b2   : > { %3563 = vmatprep.subr.bf16.mxu1 %v4097_v32 }
 0x2b5   : > { %3564 = vmatpush3.bf16.msra.mxu1 %v3926_v55  ;;  %v2004_v55 = vrot.slane %v4533_v21, %v2003_v54 }
 0x2b6   : > { %3565 = vmatprep.subr.bf16.mxu1 %v4097_v32 }
 0x2b8   : > { %1798 = vmatmul.mubr.bf16.gmra.mrb[4].mxu1 %v3924_v56 }
 0x2b9   : > { %3566 = vmatpush3.bf16.msra.mxu1 %v3927_v57  ;;  %3577 = vmatprep.mubr.msk.bf16.mxu1 %vm4098_vm0, %v4097_v32 }
 0x2ba   : > { %3567 = vmatprep.subr.bf16.mxu1 %v4097_v32 }
 0x2bd   : > { %3568 = vmatpush3.bf16.msra.mxu1 %v3929_v58 }
 0x2be   : > { %3569 = vmatprep.subr.bf16.mxu1 %v4097_v32 }
 0x2c1   : > { %3570 = vmatpush3.bf16.msra.mxu1 %v3931_v59 }
 0x2c2   : > { %3571 = vmatprep.subr.bf16.mxu1 %v4097_v32 }
 0x2c5   : > { %3572 = vmatpush3.bf16.msra.mxu1 %v3933_v60  ;;  %v3953_v60 = vld [vmem:[%s4891_s3 + $0x80] sm:$0xff]  }
 0x2c6   : > { %3573 = vmatprep.subr.bf16.mxu1 %v4097_v32 }
 0x2c9   : > { %3574 = vmatpush3.bf16.msra.mxu1 %v3935_v61 }
 0x2ca   : > { %3575 = vmatprep.subr.bf16.mxu1 %v4097_v32 }
 0x2cd   : > { %3576 = vmatpush3.bf16.msra.mxu1 %v3937_v63  ;;  %v3954_v63 = vld [vmem:[%s4891_s3 + $0x88] sm:$0xff]  }
 0x2ce   : > { %3581 = vmatprep.subr.bf16.mxu1 %v4097_v32 }
 0x383   : > { %v1789_v4 = vpop.f32.mrb[0].mxu1 }
 0x384   : > { %v4503_v5 = vpop.f32.mrb[1].mxu1 }
 0x385   : > { %v1793_v6 = vpop.f32.mrb[2].mxu1 }
 0x386   : > { %v4508_v8 = vpack.c.bf16 %v1793_v6, %v1789_v4  ;;  %v4510_v9 = vpop.f32.mrb[3].mxu1  ;;  %v3958_v4 = vld [vmem:[%s4891_s3 + $0xa8] sm:$0xff]   ;;  %v3959_v6 = vld [vmem:[%s4891_s3 + $0xb0] sm:$0xff]  }
 0x387   : > { %v1807_v10 = vpack.c.bf16 %v4510_v9, %v4503_v5 }
 0x388   : > { %3578 = vmatmul.mubr.bf16.vlgmr.msra.gmra.mrb[8].mxu1 %v4508_v8  ;;  %v2006_v44 = vrot.slane %v4508_v8, 2 }
 0x389   : > { %3582 = vmatpush3.bf16.msra.mxu1 %v3941_v7  ;;  %3585 = vmatprep.mubr.msk.bf16.mxu1 %vm4098_vm0, %v4097_v32  ;;  %v3960_v7 = vld [vmem:[%s4891_s3 + $0xb8] sm:$0xff]  }
 0x38a   : > { %3583 = vmatprep.subr.bf16.mxu1 %v4097_v32 }
 0x38b   : > { %v1799_v11 = vpop.f32.mrb[4].mxu1 }
 0x38c   : > { %v1800_v12 = vpop.f32.mrb[5].mxu1  ;;  %v2182_v11 = vrot.slane %v4508_v8, 4  ;;  %v2105_v8 = vrot.slane %v4597_v47, %v2003_v54 }
 0x38d   : > { %v1802_v13 = vpop.f32.mrb[6].mxu1  ;;  %3584 = vmatpush3.bf16.msra.mxu1 %v3942_v17 }
 0x38e   : > { %v1803_v14 = vpop.f32.mrb[7].mxu1  ;;  %3589 = vmatprep.subr.bf16.mxu1 %v4097_v32  ;;  %v3962_v13 = vld [vmem:[%s4893_s5 + $0x28] sm:$0xff]  }
 0x38f   : > { %v4518_v15 = vpack.c.bf16 %v1803_v14, %v1800_v12  ;;  %v3961_v12 = vld [vmem:[%s4893_s5 + $0x20] sm:$0xff]  }
 0x391   : > { %v2710_v16 = vrot.slane %v4518_v15, 2 }
 0x393   : > { %3718 = vmatmul.mubr.bf16.vlgmr.msra.gmra.mrb[192].mxu0 %v2710_v16 }
 0x394   : > { %3753 = vmatprep.mubr.msk.bf16.mxu0 %vm4098_vm0, %v4097_v32 }
 0x45b   : > { %v1913_v23 = vpop.f32.mrb[8].mxu1 }
 0x45c   : > { %v4536_v24 = vadd.f32 %v1913_v23, %v1830_v22  ;;  %v3579_v25 = vpop.f32.mrb[9].mxu1  ;;  %v2180_v22 = vsub.s32 2, %v4527_v19 }
 0x45d   : > { %v1916_v26 = vpop.f32.mrb[10].mxu1 }
 0x45e   : > { %v1919_v28 = vpack.c.bf16 %v4536_v24, %v4536_v24  ;;  %v3580_v29 = vpop.f32.mrb[11].mxu1  ;;  %v2181_v23 = vrot.slane %v4533_v21, %v2180_v22 }
 0x45f   : > { %v3963_v29 = vld [vmem:[%s4891_s3 + $0xc0] sm:$0xff]  }
 0x460   : > { %3586 = vmatmul.mubr.msk.bf16.vlgmr.msra.gmra.mrb[12].mxu1 %vm1940_vm1, %v1919_v28 }
 0x461   : > { %3590 = vmatpush3.bf16.msra.mxu1 %v3943_v27  ;;  %3605 = vmatprep.mubr.msk.bf16.mxu1 %vm4098_vm0, %v4097_v32 }
 0x462   : > { %3591 = vmatprep.subr.bf16.mxu1 %v4097_v32 }
 0x465   : > { %3592 = vmatpush3.bf16.msra.mxu1 %v3944_v0 }
 0x466   : > { %v2794_v34 = vpop.f32.mrb[192].mxu0  ;;  %3593 = vmatprep.subr.bf16.mxu1 %v4097_v32 }
 0x467   : > { %v4558_v35 = vadd.f32 %v2794_v34, %v2708_v31  ;;  %v3719_v36 = vpop.f32.mrb[193].mxu0  ;;  %v3965_v34 = vld [vmem:[%s4891_s3 + $0xd0] sm:$0xff]  }
 0x468   : > { %v2797_v37 = vpop.f32.mrb[194].mxu0  ;;  %v3966_v36 = vld [vmem:[%s4891_s3 + $0xd8] sm:$0xff]  }
 0x469   : > { %3594 = vmatpush3.bf16.msra.mxu1 %v3945_v33  ;;  %3054 = vrot.lane.b32.xlu0 %v4558_v35, %s4099_s18  ;;  %v3720_v38 = vpop.f32.mrb[195].mxu0  ;;  %v3964_v33 = vld [vmem:[%s4891_s3 + $0xc8] sm:$0xff]   ;;  %v3967_v37 = vld [vmem:[%s4891_s3 + $0xe0] sm:$0xff]  }
 0x46a   : > { %3595 = vmatprep.subr.bf16.mxu1 %v4097_v32  ;;  %v3968_v38 = vld [vmem:[%s4891_s3 + $0xe8] sm:$0xff]  }
 0x46d   : > { %3596 = vmatpush3.bf16.msra.mxu1 %v3946_v39  ;;  %v3969_v39 = vld [vmem:[%s4891_s3 + $0xf0] sm:$0xff]  }
 0x46e   : > { %3597 = vmatprep.subr.bf16.mxu1 %v4097_v32 }
 0x471   : > { %3598 = vmatpush3.bf16.msra.mxu1 %v3947_v40  ;;  %v3970_v40 = vld [vmem:[%s4891_s3 + $0xf8] sm:$0xff]  }
 0x472   : > { %3599 = vmatprep.subr.bf16.mxu1 %v4097_v32 }
 0x475   : > { %3600 = vmatpush3.bf16.msra.mxu1 %v3948_v41  ;;  %v2359_v41 = vrot.slane %v1807_v10, 6 }
 0x476   : > { %3601 = vmatprep.subr.bf16.mxu1 %v4097_v32 }
 0x479   : > { %3602 = vmatpush3.bf16.msra.mxu1 %v3949_v42  ;;  %v3971_v42 = vld [vmem:[%s4893_s5 + $0x30] sm:$0xff]  }
 0x47a   : > { %3603 = vmatprep.subr.bf16.mxu1 %v4097_v32 }
 0x47d   : > { %3604 = vmatpush3.bf16.msra.mxu1 %v3950_v43  ;;  %v3972_v43 = vld [vmem:[%s4893_s5 + $0x38] sm:$0xff]  }
 0x47e   : > { %3609 = vmatprep.subr.bf16.mxu1 %v4097_v32 }
 0x480   : > { %3606 = vmatmul.mubr.bf16.vlgmr.msra.gmra.mrb[16].mxu1 %v2006_v44 }
 0x481   : > { %3613 = vmatprep.mubr.msk.bf16.mxu1 %vm4098_vm0, %v4097_v32  ;;  %3610 = vmatpush3.bf16.msra.mxu1 %v3951_v45  ;;  %v2356_v45 = vsub.s32 3, %v4527_v19 }
 0x482   : > { %3611 = vmatprep.subr.bf16.mxu1 %v4097_v32 }
 0x485   : > { %3612 = vmatpush3.bf16.msra.mxu1 %v3952_v46  ;;  %v2357_v46 = vrot.slane %v4533_v21, %v2356_v45 }
 0x486   : > { %3617 = vmatprep.subr.bf16.mxu1 %v4097_v32 }
 0x533   : > { %v1978_v49 = vpop.f32.mrb[12].mxu1 }
 0x534   : > { %v1979_v50 = vadd.f32 %v1978_v49, %v1927_v48  ;;  %v3587_v51 = vpop.f32.mrb[13].mxu1 }
 0x535   : > { %v1981_v52 = vpop.f32.mrb[14].mxu1 }
 0x536   : > { %3062 = vrot.lane.b32.xlu1 %v1979_v50, %s4100_s16  ;;  %v3588_v53 = vpop.f32.mrb[15].mxu1  ;;  %v3973_v52 = vld [vmem:[%s4891_s3 + $0x100] sm:$0xff]  }
 0x553   : > { %v2090_v56 = vpop.f32.mrb[16].mxu1 }
 0x554   : > { %v2091_v57 = vadd.f32 %v2090_v56, %v2004_v55  ;;  %v3607_v58 = vpop.f32.mrb[17].mxu1  ;;  %v3974_v55 = vld [vmem:[%s4891_s3 + $0x108] sm:$0xff]   ;;  %v3975_v56 = vld [vmem:[%s4891_s3 + $0x110] sm:$0xff]  }
 0x555   : > { %v2093_v59 = vpop.f32.mrb[18].mxu1  ;;  %v3977_v58 = vld [vmem:[%s4891_s3 + $0x120] sm:$0xff]  }
 0x556   : > { %v2096_v61 = vpack.c.bf16 %v2091_v57, %v2091_v57  ;;  %v3608_v62 = vpop.f32.mrb[19].mxu1  ;;  %3042 = vrot.lane.b32.xlu0 %v2091_v57, %s4099_s18  ;;  %v3976_v57 = vld [vmem:[%s4891_s3 + $0x118] sm:$0xff]   ;;  %v3978_v59 = vld [vmem:[%s4891_s3 + $0x128] sm:$0xff]  }
 0x557   : > { %v3981_v62 = vld [vmem:[%s4893_s5 + $0x40] sm:$0xff]  }
 0x558   : > { %3614 = vmatmul.mubr.msk.bf16.vlgmr.msra.gmra.mrb[20].mxu1 %vm1940_vm1, %v2096_v61  ;;  %v3980_v61 = vld [vmem:[%s4891_s3 + $0x138] sm:$0xff]  }
 0x559   : > { %3618 = vmatpush3.bf16.msra.mxu1 %v3953_v60  ;;  %3633 = vmatprep.mubr.msk.bf16.mxu1 %vm4098_vm0, %v4097_v32  ;;  %v3979_v60 = vld [vmem:[%s4891_s3 + $0x130] sm:$0xff]  }
 0x55a   : > { %3619 = vmatprep.subr.bf16.mxu1 %v4097_v32 }
 0x55d   : > { %3620 = vmatpush3.bf16.msra.mxu1 %v3954_v63  ;;  %v3982_v63 = vld [vmem:[%s4893_s5 + $0x48] sm:$0xff]  }
 0x55e   : > { %3621 = vmatprep.subr.bf16.mxu1 %v4097_v32 }
 0x561   : > { %3622 = vmatpush3.bf16.msra.mxu1 %v3955_v1  ;;  %v2458_v1 = vrot.slane %v4597_v47, %v2356_v45 }
 0x562   : > { %3623 = vmatprep.subr.bf16.mxu1 %v4097_v32 }
 0x565   : > { %3624 = vmatpush3.bf16.msra.mxu1 %v3956_v2 }
 0x566   : > { %3625 = vmatprep.subr.bf16.mxu1 %v4097_v32 }
 0x569   : > { %3626 = vmatpush3.bf16.msra.mxu1 %v3957_v3 }
 0x56a   : > { %3627 = vmatprep.subr.bf16.mxu1 %v4097_v32 }
 0x56d   : > { %3628 = vmatpush3.bf16.msra.mxu1 %v3958_v4 }
 0x56e   : > { %3629 = vmatprep.subr.bf16.mxu1 %v4097_v32 }
 0x571   : > { %3630 = vmatpush3.bf16.msra.mxu1 %v3959_v6 }
 0x572   : > { %3631 = vmatprep.subr.bf16.mxu1 %v4097_v32 }
 0x575   : > { %3632 = vmatpush3.bf16.msra.mxu1 %v3960_v7 }
 0x576   : > { %3637 = vmatprep.subr.bf16.mxu1 %v4097_v32 }
 0x578   : > { %3634 = vmatmul.mubr.bf16.vlgmr.msra.gmra.mrb[24].mxu1 %v2182_v11  ;;  %v2533_v11 = vsub.s32 4, %v4527_v19 }
 0x579   : > { %3641 = vmatprep.mubr.msk.bf16.mxu1 %vm4098_vm0, %v4097_v32  ;;  %3638 = vmatpush3.bf16.msra.mxu1 %v3961_v12 }
 0x57a   : > { %3639 = vmatprep.subr.bf16.mxu1 %v4097_v32  ;;  %v2534_v12 = vrot.slane %v4533_v21, %v2533_v11 }
 0x57d   : > { %3640 = vmatpush3.bf16.msra.mxu1 %v3962_v13 }
 0x57e   : > { %3645 = vmatprep.subr.bf16.mxu1 %v4097_v32 }
 0x62b   : > { %v2155_v14 = vpop.f32.mrb[20].mxu1 }
 0x62c   : > { %v2156_v16 = vadd.f32 %v2155_v14, %v2105_v8  ;;  %v3615_v17 = vpop.f32.mrb[21].mxu1 }
 0x62d   : > { %v2158_v18 = vpop.f32.mrb[22].mxu1  ;;  %v3983_v17 = vld [vmem:[%s4893_s5 + $0x50] sm:$0xff]  }
 0x62e   : > { %v3616_v20 = vpop.f32.mrb[23].mxu1  ;;  %3066 = vrot.lane.b32.xlu0 %v2156_v16, %s4101_s22 }
 0x64b   : > { %v2266_v25 = vpop.f32.mrb[24].mxu1 }
 0x64c   : > { %v2267_v26 = vadd.f32 %v2266_v25, %v2181_v23  ;;  %v3635_v27 = vpop.f32.mrb[25].mxu1  ;;  %v3984_v23 = vld [vmem:[%s4893_s5 + $0x58] sm:$0xff]   ;;  %v3985_v25 = vld [vmem:[%s4891_s3 + $0x180] sm:$0xff]  }
 0x64d   : > { %v2269_v28 = vpop.f32.mrb[26].mxu1  ;;  %v3986_v27 = vld [vmem:[%s4891_s3 + $0x188] sm:$0xff]  }
 0x64e   : > { %v2272_v0 = vpack.c.bf16 %v2267_v26, %v2267_v26  ;;  %v3636_v31 = vpop.f32.mrb[27].mxu1  ;;  %3046 = vrot.lane.b32.xlu0 %v2267_v26, %s4102_s14  ;;  %v2800_v26 = vpack.c.bf16 %v4558_v35, %v4558_v35  ;;  %v3987_v28 = vld [vmem:[%s4891_s3 + $0x190] sm:$0xff]   ;;  %v3988_v35 = vld [vmem:[%s4891_s3 + $0x198] sm:$0xff]  }
 0x64f   : > { %v3991_v31 = vld [vmem:[%s4891_s3 + $0x1b0] sm:$0xff]  }
 0x650   : > { %3642 = vmatmul.mubr.msk.bf16.vlgmr.msra.gmra.mrb[28].mxu1 %vm1940_vm1, %v2272_v0  ;;  %v3990_v0 = vld [vmem:[%s4891_s3 + $0x1a8] sm:$0xff]  }
 0x651   : > { %3646 = vmatpush3.bf16.msra.mxu1 %v3963_v29  ;;  %3661 = vmatprep.mubr.msk.bf16.mxu1 %vm4098_vm0, %v4097_v32  ;;  %v3989_v29 = vld [vmem:[%s4891_s3 + $0x1a0] sm:$0xff]  }
 0x652   : > { %3647 = vmatprep.subr.bf16.mxu1 %v4097_v32 }
 0x655   : > { %3648 = vmatpush3.bf16.msra.mxu1 %v3964_v33  ;;  %v3992_v33 = vld [vmem:[%s4891_s3 + $0x1b8] sm:$0xff]  }
 0x656   : > { %3649 = vmatprep.subr.bf16.mxu1 %v4097_v32 }
 0x659   : > { %3650 = vmatpush3.bf16.msra.mxu1 %v3965_v34  ;;  %v2886_v34 = vrot.slane %v4518_v15, 4 }
 0x65a   : > { %3651 = vmatprep.subr.bf16.mxu1 %v4097_v32 }
 0x65d   : > { %3652 = vmatpush3.bf16.msra.mxu1 %v3966_v36  ;;  %v3993_v36 = vld [vmem:[%s4893_s5 + $0x60] sm:$0xff]  }
 0x65e   : > { %3653 = vmatprep.subr.bf16.mxu1 %v4097_v32  ;;  %3750 = vmatpush3.bf16.msra.mxu0 %v3993_v36 }
 0x65f   : > { %3751 = vmatprep.subr.bf16.mxu0 %v4097_v32 }
 0x661   : > { %3654 = vmatpush3.bf16.msra.mxu1 %v3967_v37  ;;  %v3994_v37 = vld [vmem:[%s4893_s5 + $0x68] sm:$0xff]  }
 0x662   : > { %3655 = vmatprep.subr.bf16.mxu1 %v4097_v32  ;;  %3752 = vmatpush3.bf16.msra.mxu0 %v3994_v37 }
 0x665   : > { %3656 = vmatpush3.bf16.msra.mxu1 %v3968_v38  ;;  %v2632_v38 = vrot.slane %v4597_v47, %v2533_v11 }
 0x666   : > { %3657 = vmatprep.subr.bf16.mxu1 %v4097_v32 }
 0x669   : > { %3658 = vmatpush3.bf16.msra.mxu1 %v3969_v39 }
 0x66a   : > { %3659 = vmatprep.subr.bf16.mxu1 %v4097_v32 }
 0x66d   : > { %3660 = vmatpush3.bf16.msra.mxu1 %v3970_v40 }
 0x66e   : > { %3665 = vmatprep.subr.bf16.mxu1 %v4097_v32 }
 0x670   : > { %3662 = vmatmul.mubr.bf16.vlgmr.msra.gmra.mrb[32].mxu1 %v2359_v41 }
 0x671   : > { %3669 = vmatprep.mubr.msk.bf16.mxu1 %vm4098_vm0, %v4097_v32  ;;  %3666 = vmatpush3.bf16.msra.mxu1 %v3971_v42 }
 0x672   : > { %3667 = vmatprep.subr.bf16.mxu1 %v4097_v32 }
 0x675   : > { %3668 = vmatpush3.bf16.msra.mxu1 %v3972_v43 }
 0x676   : > { %3673 = vmatprep.subr.bf16.mxu1 %v4097_v32 }
 0x723   : > { %v4704_v5 = vpop.f32.mrb[28].mxu1 }
 0x724   : > { %v3643_v9 = vpop.f32.mrb[29].mxu1 }
 0x725   : > { %v2334_v10 = vpop.f32.mrb[30].mxu1 }
 0x726   : > { %v3644_v44 = vpop.f32.mrb[31].mxu1 }
 0x743   : > { %v2443_v48 = vpop.f32.mrb[32].mxu1 }
 0x744   : > { %v2444_v49 = vadd.f32 %v2443_v48, %v2357_v46  ;;  %v3663_v50 = vpop.f32.mrb[33].mxu1  ;;  %v2809_v48 = vrot.slane %v4597_v47, %v2707_v30 }
 0x745   : > { %v2446_v51 = vpop.f32.mrb[34].mxu1 }
 0x746   : > { %v2449_v53 = vpack.c.bf16 %v2444_v49, %v2444_v49  ;;  %3050 = vrot.lane.b32.xlu1 %v2444_v49, %s4100_s16  ;;  %v3664_v54 = vpop.f32.mrb[35].mxu1  ;;  %s4845_s16 = scalar_lea.hbm %s4895_s7, %s3777_s11 }
 0x748   : > { %3670 = vmatmul.mubr.msk.bf16.vlgmr.msra.gmra.mrb[36].mxu1 %vm1940_vm1, %v2449_v53 }
 0x749   : > { %3674 = vmatpush3.bf16.msra.mxu1 %v3973_v52  ;;  %3689 = vmatprep.mubr.msk.bf16.mxu1 %vm4098_vm0, %v4097_v32 }
 0x74a   : > { %3675 = vmatprep.subr.bf16.mxu1 %v4097_v32 }
 0x74d   : > { %3676 = vmatpush3.bf16.msra.mxu1 %v3974_v55  ;;  %v3055_v55 = vpop.permute.xlu0 %3054 }
 0x74e   : > { %3677 = vmatprep.subr.bf16.mxu1 %v4097_v32 }
 0x751   : > { %3678 = vmatpush3.bf16.msra.mxu1 %v3975_v56  ;;  %v3043_v56 = vpop.permute.xlu0 %3042 }
 0x752   : > { %3679 = vmatprep.subr.bf16.mxu1 %v4097_v32 }
 0x755   : > { %3680 = vmatpush3.bf16.msra.mxu1 %v3976_v57 }
 0x756   : > { %3681 = vmatprep.subr.bf16.mxu1 %v4097_v32 }
 0x759   : > { %3682 = vmatpush3.bf16.msra.mxu1 %v3977_v58  ;;  %v3067_v58 = vpop.permute.xlu0 %3066 }
 0x75a   : > { %3683 = vmatprep.subr.bf16.mxu1 %v4097_v32 }
 0x75d   : > { %3684 = vmatpush3.bf16.msra.mxu1 %v3978_v59  ;;  %v3047_v30 = vpop.permute.xlu0 %3046 }
 0x75e   : > { %3685 = vmatprep.subr.bf16.mxu1 %v4097_v32 }
 0x761   : > { %3686 = vmatpush3.bf16.msra.mxu1 %v3979_v60 }
 0x762   : > { %3687 = vmatprep.subr.bf16.mxu1 %v4097_v32 }
 0x765   : > { %3688 = vmatpush3.bf16.msra.mxu1 %v3980_v61 }
 0x766   : > { %3693 = vmatprep.subr.bf16.mxu1 %v4097_v32 }
 0x768   : > { %3690 = vmatmul.mubr.bf16.vlgmr.msra.gmra.mrb[40].mxu1 %v4518_v15 }
 0x769   : > { %3697 = vmatprep.mubr.msk.bf16.mxu1 %vm4098_vm0, %v4097_v32  ;;  %3694 = vmatpush3.bf16.msra.mxu1 %v3981_v62  ;;  %v3085_v62 = vsel %vm1940_vm1, %v4536_v24, %v3043_v56 }
 0x76a   : > { %3695 = vmatprep.subr.bf16.mxu1 %v4097_v32 }
 0x76d   : > { %3696 = vmatpush3.bf16.msra.mxu1 %v3982_v63 }
 0x76e   : > { %3721 = vmatprep.subr.bf16.mxu1 %v4097_v32 }
 0x81b   : > { %v2508_v2 = vpop.f32.mrb[36].mxu1 }
 0x81c   : > { %v2509_v3 = vadd.f32 %v2508_v2, %v2458_v1  ;;  %v3671_v4 = vpop.f32.mrb[37].mxu1  ;;  %v3087_v1 = vsel %vm3086_vm2, %v3085_v62, %v3047_v30 }
 0x81d   : > { %v2511_v6 = vpop.f32.mrb[38].mxu1 }
 0x81e   : > { %3070 = vrot.lane.b32.xlu1 %v2509_v3, %s4103_s20  ;;  %v3672_v7 = vpop.f32.mrb[39].mxu1  ;;  %s4029_s20 = sshll.u32 %s4105_s19, 4  ;;  %s4030_s20 = int_to_ptr.vmem [resolvable:$false] %s4029_s20 }
 0x81f   : > { %s4031_s22 = scalar_lea.vmem %s4030_s20, 384  ;;  %p4032_p8 = scmp.lt.s32.totalorder %s4847_s29, %s4030_s20 }
 0x820   : > { %p4033_p9 = scmp.lt.s32.totalorder %s4031_s22, %s4025_s17 }
 0x822   : > { %p4034_p13 = por %p4033_p9, %p4032_p8 }
 0x824   : > { %p4035_p1 = pnand %p4034_p13, %p4028_p12 }
 0x83b   : > { %v2617_v13 = vpop.f32.mrb[40].mxu1 }
 0x83c   : > { %v4758_v8 = vadd.f32 %v2617_v13, %v2534_v12  ;;  %v3691_v14 = vpop.f32.mrb[41].mxu1 }
 0x83d   : > { %v2620_v16 = vpop.f32.mrb[42].mxu1  ;;  %v2281_v14 = vrot.slane %v4597_v47, %v2180_v22 }
 0x83e   : > { %v2623_v18 = vpack.c.bf16 %v4758_v8, %v4758_v8  ;;  %v3692_v20 = vpop.f32.mrb[43].mxu1  ;;  %v3090_v60 = vsel %vm1940_vm1, %v4758_v8, %v3055_v55 }
 0x83f   : > { %v2332_v16 = vadd.f32 %v4704_v5, %v2281_v14 }
 0x840   : > { %3698 = vmatmul.mubr.msk.bf16.vlgmr.msra.gmra.mrb[44].mxu1 %vm1940_vm1, %v2623_v18 }
 0x841   : > { %3722 = vmatpush3.bf16.msra.mxu1 %v3983_v17  ;;  %3725 = vmatprep.mubr.msk.bf16.mxu1 %vm4098_vm0, %v4097_v32 }
 0x842   : > { %3723 = vmatprep.subr.bf16.mxu1 %v4097_v32 }
 0x845   : > { %3724 = vmatpush3.bf16.msra.mxu1 %v3984_v23 }
 0x846   : > { %3729 = vmatprep.subr.bf16.mxu1 %v4097_v32 }
 0x848   : > { %3726 = vmatmul.mubr.msk.bf16.vlgmr.msra.gmra.mrb[48].mxu1 %vm1940_vm1, %v2800_v26 }
 0x849   : > { %3730 = vmatpush3.bf16.msra.mxu1 %v3985_v25  ;;  %3745 = vmatprep.mubr.msk.bf16.mxu1 %vm4098_vm0, %v4097_v32 }
 0x84a   : > { %3731 = vmatprep.subr.bf16.mxu1 %v4097_v32 }
 0x84d   : > { %3732 = vmatpush3.bf16.msra.mxu1 %v3986_v27 }
 0x84e   : > { %3733 = vmatprep.subr.bf16.mxu1 %v4097_v32 }
 0x851   : > { %3734 = vmatpush3.bf16.msra.mxu1 %v3987_v28 }
 0x852   : > { %3735 = vmatprep.subr.bf16.mxu1 %v4097_v32 }
 0x855   : > { %3736 = vmatpush3.bf16.msra.mxu1 %v3988_v35 }
 0x856   : > { %3737 = vmatprep.subr.bf16.mxu1 %v4097_v32 }
 0x859   : > { %3738 = vmatpush3.bf16.msra.mxu1 %v3989_v29 }
 0x85a   : > { %3739 = vmatprep.subr.bf16.mxu1 %v4097_v32 }
 0x85d   : > { %3740 = vmatpush3.bf16.msra.mxu1 %v3990_v0 }
 0x85e   : > { %3741 = vmatprep.subr.bf16.mxu1 %v4097_v32 }
 0x861   : > { %3742 = vmatpush3.bf16.msra.mxu1 %v3991_v31 }
 0x862   : > { %3743 = vmatprep.subr.bf16.mxu1 %v4097_v32  ;;  %v2884_v32 = vsub.s32 6, %v4527_v19 }
 0x864   : > { %v2885_v45 = vrot.slane %v4533_v21, %v2884_v32  ;;  %v3063_v21 = vpop.permute.xlu1 %3062  ;;  %v2985_v7 = vrot.slane %v4597_v47, %v2884_v32 }
 0x865   : > { %3744 = vmatpush3.bf16.msra.mxu1 %v3992_v33 }
 0x868   : > { %3746 = vmatmul.mubr.bf16.vlgmr.msra.gmra.mrb[52].mxu1 %v2886_v34  ;;  %v3051_v57 = vpop.permute.xlu1 %3050 }
 0x869   : > { %v3089_v3 = vsel %vm3088_vm3, %v3087_v1, %v3051_v57 }
 0x890   : > { %v3071_v59 = vpop.permute.xlu1 %3070 }
 0x891   : > { %v3096_v20 = vsel %vm3095_vm5, %v2332_v16, %v3071_v59 }
 0x913   : > { %v2682_v39 = vpop.f32.mrb[44].mxu1 }
 0x914   : > { %v2683_v40 = vadd.f32 %v2682_v39, %v2632_v38  ;;  %v3699_v41 = vpop.f32.mrb[45].mxu1 }
 0x915   : > { %v2685_v42 = vpop.f32.mrb[46].mxu1 }
 0x916   : > { %3074 = vrot.lane.b32.xlu0 %v2683_v40, %s4099_s18  ;;  %v3700_v15 = vpop.f32.mrb[47].mxu1  ;;  %s4104_s18 = smov 48  }
 0x91b   : > { %v2859_v43 = vpop.f32.mrb[48].mxu1 }
 0x91c   : > { %v3727_v9 = vpop.f32.mrb[49].mxu1  ;;  %v2860_v54 = vadd.f32 %v2859_v43, %v2809_v48 }
 0x91d   : > { %v2862_v10 = vpop.f32.mrb[50].mxu1 }
 0x91e   : > { %v3728_v44 = vpop.f32.mrb[51].mxu1 }
 0x93b   : > { %v2970_v46 = vpop.f32.mrb[52].mxu1 }
 0x93c   : > { %v2971_v49 = vadd.f32 %v2970_v46, %v2885_v45  ;;  %v3747_v50 = vpop.f32.mrb[53].mxu1 }
 0x93d   : > { %v2973_v51 = vpop.f32.mrb[54].mxu1 }
 0x93e   : > { %v2976_v52 = vpack.c.bf16 %v2971_v49, %v2971_v49  ;;  %3058 = vrot.lane.b32.xlu1 %v2971_v49, %s4102_s14  ;;  %v3748_v53 = vpop.f32.mrb[55].mxu1 }
 0x940   : > { %3754 = vmatmul.mubr.msk.bf16.vlgmr.msra.gmra.mrb[196].mxu0 %vm1940_vm1, %v2976_v52 }
 0x942   : > { %3078 = vrot.lane.b32.xlu1 %v2860_v54, %s4104_s18 }
 0x988   : > { %v3075_v17 = vpop.permute.xlu0 %3074 }
 0x989   : > { %v3097_v23 = vsel %vm1940_vm1, %v3096_v20, %v3075_v17 }
 0x9b0   : > { %v3059_v61 = vpop.permute.xlu1 %3058 }
 0x9b1   : > { %v3091_v63 = vsel %vm3086_vm2, %v3090_v60, %v3059_v61 }
 0x9b2   : > { %v3092_v2 = vsel %vm3088_vm3, %v3091_v63, %v3063_v21 }
 0x9b3   : > { %v3094_v4 = vsel %vm3093_vm4, %v3092_v2, %v3067_v58 }
 0x9b4   : > { %v3105_v6 = vcombine.low %v3089_v3, %v3094_v4  ;;  %v3079_v18 = vpop.permute.xlu1 %3078 }
 0x9b5   : > { %v3099_v25 = vsel %vm3098_vm6, %v3097_v23, %v3079_v18 }
 0x9b6   : > { %3107 = vst [vmem:[%s297_s8] sm:$0xff] %v3105_v6 }
 0xa13   : > { %v3035_v11 = vpop.f32.mrb[196].mxu0 }
 0xa14   : > { %v3036_v12 = vadd.f32 %v3035_v11, %v2985_v7  ;;  %v3755_v13 = vpop.f32.mrb[197].mxu0 }
 0xa15   : > { %v3038_v8 = vpop.f32.mrb[198].mxu0 }
 0xa16   : > { %3082 = vrot.lane.b32.xlu0 %v3036_v12, %s4102_s14  ;;  %v3756_v24 = vpop.f32.mrb[199].mxu0 }
 0xa88   : > { %v3083_v26 = vpop.permute.xlu0 %3082 }
 0xa89   : > { %v3100_v19 = vsel %vm3086_vm2, %v3099_v25, %v3083_v26 }
 0xa8a   : > { %v3102_v47 = vsel %vm3101_vm7, %v3100_v19, 0.0 }
 0xa8b   : > { %3108 = vst [vmem:[%s297_s8 + $0x8] sm:$0xf] %v3102_v47 }
 0xa8c   : > { %4038 = shalt.err (!%p4035_p1)
}
 0xa8d   : > { %s4039_s15 = scalar_lea.hbm %s4845_s16, 192  ;;  %s4043_s21 = scalar_lea.hbm %s4895_s7, 768 }
 0xa8e   : > { %p4040_p3 = scmp.ne.s32.totalorder %s4845_s16, %s4039_s15  ;;  %p4044_p0 = scmp.lt.u32.totalorder %s4845_s16, %s4895_s7 }
 0xa8f   : > { %p4045_p2 = scmp.lt.u32.totalorder %s4043_s21, %s4039_s15  ;;  %p4047_p6 = scmp.lt.u32.totalorder %s4039_s15, %s4845_s16 }
 0xa90   : > { %p4041_p4 = pnand %p4040_p3, %p4901_p10 }
 0xa91   : > { %p4046_p7 = por %p4045_p2, %p4044_p0 }
 0xa92   : > { %p4042_p5 = pneg %p4041_p4 }
 0xa93   : > { %p4048_p11 = por %p4047_p6, %p4046_p7 }
 0xa95   : > { %p4049_p12 = pnand %p4048_p11, %p4042_p5 }
 0xa97   : > { %4052 = shalt.err (!%p4049_p12)
}
 0xa98   : > { %3780 = dma.vmem_to_hbm [thread:$0]  (%p4901_p10), %s4847_s29, 192, %s4845_s16, %s3110_s28  }
 0xa99 PF: > { %p3791_p8 = scmp.ge.s32.totalorder %s4091_s27, 2  ;;  %s3136_s14 = sand.u32 1, %s4079_s24  }
 0xa9a   : > { %p4902_p9 = scmp.ne.s32.totalorder %s4899_s13, 0  ;;  %s3137_s9 = scalar_lea.sflag [#allocation4], %s3136_s14 }
 0xa9c   : > { %p3787_p13 = pnand %p3791_p8, %p4902_p9 }
 0xa9e   : > { %4074 = dma.done.wait (!%p3787_p13), %s3137_s9, 192  }
 0xa9f   : > { %4076 = vsyncadd (!%p3787_p13), %s3137_s9, 4294967104  ;;  %p20_p1 = scmp.ge.s32.totalorder %s4171_s30, 6   ;;  %s4903_s24 = smov %s4083_s25 }
 0xaa0   : > { %s4904_s25 = smov %s4087_s26  ;;  %s4905_s26 = smov %s4183_s10 }
 0xaa1   : > { %s4906_s27 = smov %s4171_s30  ;;  %22 = sbr.rel (!%p20_p1) target bundleno = 5 (0x5), region = 105 }
 0xaa8   :  { %3142 = vsyncpa [#allocation3], 1 }
 0xaa9   :  { %3144 = vsyncpa [#allocation3 + $0x1], 1 }
 0xaaa   :  { %3145 = vsyncpa [#allocation4], 1 }
 0xaab   :  { %3147 = vsyncpa [#allocation4 + $0x1], 1 }

</bundles_post_ra>
